<compile_context>
chip_gen: v7x
topology: tpu7x:2x2x1
jax: 0.10.0
libtpu: 0.0.40
codegen_flags: <defaults>
</compile_context>

<pallas_src>
import numpy as np
import jax
import jax.numpy as jnp
from jax import lax
from jax.experimental import pallas as pl
from jax.experimental.pallas import tpu as pltpu

# ---- static problem sizes (CNN(shape=(H, W)), small) -----------------------
N = 2                                   # batch
H, W = 22, 18                           # CNN "shape" argument (small)
KS1, KS2, PAD1 = 5, 3, 1
C1, C2 = 4, 8
HPAD, WPAD = H + 2 * PAD1, W + 2 * PAD1          # 24, 20
H1 = H - KS1 + 2 * PAD1 + 1                      # 20
W1 = W - KS1 + 2 * PAD1 + 1                      # 16
HP1, WP1 = H1 // 2, W1 // 2                      # 10, 8
H2, W2 = HP1 - KS2 + 1, WP1 - KS2 + 1            # 8, 6
HP2, WP2 = H2 // 2, W2 // 2                      # 4, 3
FLAT = C2 * HP2 * WP2                            # 96
D1, D2, D3 = 120, 84, 10
PADF = 128                                       # lane-aligned FC width
EPS = 1e-5

# ---- derived constants of the height-stacked, lane-dense layout ------------
XROWS = N * HPAD                  # 48  padded-input rows (image n at rows n*24)
Y1R = XROWS - KS1 + 1             # 44  conv1 rows (cross-image rows are junk)
P1R = Y1R - 1                     # 43  after row pool (valid at even offsets)
P1L = C1 * W1 - 1                 # 63  after col pool (valid at even offsets)
Y2R = P1R - 2 * (KS2 - 1)         # 39  conv2 rows
P2R = Y2R - 2                     # 37  after row pool
P2L = C2 * W2 - 1                 # 47  after col pool
# parameter-slab row offsets (f32 slab pw: (PW_ROWS, 128))
M1_OFF = 0                        # M1[kh] at rows [24*kh, 24*kh+20), cols [0,64)
M2_OFF = KS1 * 24                 # 120: M2[kh] at rows [120+64*kh, +63), cols [0,48)
VEC_OFF = M2_OFF + KS2 * 64       # 312: 13 bias / BN-scale / BN-shift rows
PW_ROWS = VEC_OFF + 16            # 328


# ------------------------------ fused kernel --------------------------------
def cnn_kernel(x_ref, pw_ref, wf_ref, o_ref, xp_ref):
    f32 = jnp.float32

    # ---- in-kernel zero pad: x (N,1,H,W) -> scratch (N*HPAD, WPAD) ---------
    xp_ref[...] = jnp.zeros((XROWS, WPAD), f32)
    xp_ref[PAD1:PAD1 + H, PAD1:PAD1 + W] = x_ref[0, 0]
    xp_ref[HPAD + PAD1:HPAD + PAD1 + H, PAD1:PAD1 + W] = x_ref[1, 0]
    xp = xp_ref[...]                                            # (48, 20)

    # ---- conv1: 5 banded matmuls, output lanes = c1*16 + col ---------------
    y1 = jnp.zeros((Y1R, C1 * W1), f32)                         # (44, 64)
    for kh in range(KS1):
        m1 = pw_ref[M1_OFF + 24 * kh:M1_OFF + 24 * kh + WPAD, 0:C1 * W1]
        y1 = y1 + jnp.dot(xp[kh:kh + Y1R, :], m1,
                          preferred_element_type=f32)
    b = pw_ref[VEC_OFF + 0:VEC_OFF + 1, 0:C1 * W1]
    sc = pw_ref[VEC_OFF + 1:VEC_OFF + 2, 0:C1 * W1]
    sh = pw_ref[VEC_OFF + 2:VEC_OFF + 3, 0:C1 * W1]
    y1 = jnp.maximum(y1 + b, 0.0) * sc + sh                     # bias+ReLU+BN1

    # ---- 2x2 max pool: shift+max; the stride-2 selection is folded into M2 -
    p1 = jnp.maximum(y1[:-1, :], y1[1:, :])                     # rows  (43, 64)
    p1 = jnp.maximum(p1[:, :-1], p1[:, 1:])                     # lanes (43, 63)
    # valid entries: row n*24 + 2*i, lane c1*16 + 2*j -> pooled1[n, c1, i, j]

    # ---- conv2: 3 banded matmuls on the dilated pooled layout --------------
    y2 = jnp.zeros((Y2R, C2 * W2), f32)                         # (39, 48)
    for kh in range(KS2):
        m2 = pw_ref[M2_OFF + 64 * kh:M2_OFF + 64 * kh + P1L, 0:C2 * W2]
        y2 = y2 + jnp.dot(p1[2 * kh:2 * kh + Y2R, :], m2,
                          preferred_element_type=f32)
    b = pw_ref[VEC_OFF + 3:VEC_OFF + 4, 0:C2 * W2]
    sc = pw_ref[VEC_OFF + 4:VEC_OFF + 5, 0:C2 * W2]
    sh = pw_ref[VEC_OFF + 5:VEC_OFF + 6, 0:C2 * W2]
    y2 = jnp.maximum(y2 + b, 0.0) * sc + sh                     # bias+ReLU+BN2

    p2 = jnp.maximum(y2[:-2, :], y2[2:, :])                     # rows  (37, 48)
    p2 = jnp.maximum(p2[:, :-1], p2[:, 1:])                     # lanes (37, 47)
    # valid entries: row n*24 + 4*i, lane c2*6 + 2*j -> pooled2[n, c2, i, j]
    p2 = p2.astype(jnp.bfloat16)

    # ---- fc1: contract the 4 valid rows per image against packed fc1 pages -
    h0 = jnp.zeros((1, PADF), f32)
    h1 = jnp.zeros((1, PADF), f32)
    for i in range(HP2):                                        # 4 pooled rows
        wp = wf_ref[i // 2, (i % 2) * 48:(i % 2) * 48 + P2L, :]  # (47, 128)
        h0 = h0 + jnp.dot(p2[4 * i:4 * i + 1, :], wp,
                          preferred_element_type=f32)
        h1 = h1 + jnp.dot(p2[HPAD + 4 * i:HPAD + 4 * i + 1, :], wp,
                          preferred_element_type=f32)
    h = jnp.concatenate([h0, h1], axis=0)                       # (2, 128)

    # ---- fc1 bias/BN3 -> fc2+BN4 -> fc3 (bf16 weights, f32 accumulation) ---
    def v(r):
        return pw_ref[VEC_OFF + r:VEC_OFF + r + 1, :]           # (1, 128) f32

    h = jnp.maximum(h + v(6), 0.0) * v(7) + v(8)
    h = jnp.dot(h.astype(jnp.bfloat16), wf_ref[2], preferred_element_type=f32)
    h = jnp.maximum(h + v(9), 0.0) * v(10) + v(11)
    o_ref[...] = jnp.dot(h.astype(jnp.bfloat16), wf_ref[3],
                         preferred_element_type=f32) + v(12)


# ------------------------------- wrappers -----------------------------------
_VMEM = pl.BlockSpec(memory_space=pltpu.MemorySpace.VMEM)


def cnn_pallas(x, kp):
    return pl.pallas_call(
        cnn_kernel,
        out_shape=jax.ShapeDtypeStruct((N, PADF), jnp.float32),
        in_specs=[_VMEM, _VMEM, _VMEM],
        out_specs=_VMEM,
        scratch_shapes=[pltpu.VMEM((XROWS, WPAD), jnp.float32)],
    )(x, kp["pw"], kp["wf"])


@jax.jit
def cnn_forward(x, kp):
    # x: (N, 1, H, W) -> logits (N, D3); padding is done inside the kernel.
    return cnn_pallas(x, kp)[:, :D3]


# --------------------------- parameter packing ------------------------------
def pack_params(p):
    """One-time repack of PyTorch-layout params into 2 kernel-ready slabs."""
    w_c1 = np.asarray(p["w_c1"], np.float32)
    w_c2 = np.asarray(p["w_c2"], np.float32)
    w_f1 = np.asarray(p["w_fc1"], np.float32)
    w_f2 = np.asarray(p["w_fc2"], np.float32)
    w_f3 = np.asarray(p["w_fc3"], np.float32)

    pw = np.zeros((PW_ROWS, PADF), np.float32)

    # conv1 band matrices: M1[kh][j + kw, c*W1 + j] = w_c1[c, 0, kh, kw]
    j = np.arange(W1)
    for kh in range(KS1):
        for kw in range(KS1):
            for c in range(C1):
                pw[M1_OFF + 24 * kh + j + kw, c * W1 + j] = w_c1[c, 0, kh, kw]

    # conv2 band matrices on the width-dilated pooled layout:
    #   M2[kh][c1*W1 + 2*(j2+kw), c2*W2 + j2] = w_c2[c2, c1, kh, kw]
    # (odd / unused rows stay zero -> they kill the pooling garbage lanes)
    j2 = np.arange(W2)
    for kh in range(KS2):
        for kw in range(KS2):
            for c1 in range(C1):
                for c2 in range(C2):
                    pw[M2_OFF + 64 * kh + c1 * W1 + 2 * (j2 + kw),
                       c2 * W2 + j2] = w_c2[c2, c1, kh, kw]

    # bias / folded-BN scale / shift rows (broadcast over width at pack time)
    pw[VEC_OFF + 0, :C1 * W1] = np.repeat(np.asarray(p["b_c1"]), W1)
    pw[VEC_OFF + 1, :C1 * W1] = np.repeat(np.asarray(p["sc1"]), W1)
    pw[VEC_OFF + 2, :C1 * W1] = np.repeat(np.asarray(p["sh1"]), W1)
    pw[VEC_OFF + 3, :C2 * W2] = np.repeat(np.asarray(p["b_c2"]), W2)
    pw[VEC_OFF + 4, :C2 * W2] = np.repeat(np.asarray(p["sc2"]), W2)
    pw[VEC_OFF + 5, :C2 * W2] = np.repeat(np.asarray(p["sh2"]), W2)
    pw[VEC_OFF + 6, :D1] = np.asarray(p["b_fc1"])
    pw[VEC_OFF + 7, :D1] = np.asarray(p["sc3"])
    pw[VEC_OFF + 8, :D1] = np.asarray(p["sh3"])
    pw[VEC_OFF + 9, :D2] = np.asarray(p["b_fc2"])
    pw[VEC_OFF + 10, :D2] = np.asarray(p["sc4"])
    pw[VEC_OFF + 11, :D2] = np.asarray(p["sh4"])
    pw[VEC_OFF + 12, :D3] = np.asarray(p["b_fc3"])

    # FC weights, bf16 stack (4, 128, 128):
    #   pages 0-1: fc1 re-laid per pooled spatial row i (two 48-row blocks per
    #              page), rows at the dilated lane positions c2*W2 + 2*j3;
    #   page 2: fc2.T zero-padded; page 3: fc3.T zero-padded.
    wf = np.zeros((4, PADF, PADF), np.float32)
    for i in range(HP2):
        pg, off = i // 2, (i % 2) * 48
        for c2 in range(C2):
            for j3 in range(WP2):
                wf[pg, off + c2 * W2 + 2 * j3, :D1] = \
                    w_f1[:, c2 * (HP2 * WP2) + i * WP2 + j3]
    wf[2, :D1, :D2] = w_f2.T
    wf[3, :D2, :D3] = w_f3.T

    return {"pw": jnp.asarray(pw),
            "wf": jnp.asarray(wf, dtype=jnp.bfloat16)}


# --------------------------- parameter init ---------------------------------
def init_params(key):
    ks = jax.random.split(key, 20)

    def bn_fold(kg, kb, c):
        gamma = jax.random.uniform(kg, (c,), jnp.float32, 0.5, 1.5)
        beta = jax.random.normal(kb, (c,), jnp.float32) * 0.1
        r_mean = jnp.zeros((c,), jnp.float32)   # fresh-module running stats
        r_var = jnp.ones((c,), jnp.float32)
        scale = gamma / jnp.sqrt(r_var + EPS)
        shift = beta - r_mean * scale
        return scale, shift

    p = {}
    p["w_c1"] = jax.random.normal(ks[0], (C1, 1, KS1, KS1), jnp.float32) * 0.2
    p["b_c1"] = jax.random.normal(ks[1], (C1,), jnp.float32) * 0.1
    p["sc1"], p["sh1"] = bn_fold(ks[2], ks[3], C1)
    p["w_c2"] = jax.random.normal(ks[4], (C2, C1, KS2, KS2), jnp.float32) * 0.2
    p["b_c2"] = jax.random.normal(ks[5], (C2,), jnp.float32) * 0.1
    p["sc2"], p["sh2"] = bn_fold(ks[6], ks[7], C2)
    p["w_fc1"] = jax.random.normal(ks[8], (D1, FLAT), jnp.float32) * 0.1
    p["b_fc1"] = jax.random.normal(ks[9], (D1,), jnp.float32) * 0.1
    p["sc3"], p["sh3"] = bn_fold(ks[10], ks[11], D1)
    p["w_fc2"] = jax.random.normal(ks[12], (D2, D1), jnp.float32) * 0.1
    p["b_fc2"] = jax.random.normal(ks[13], (D2,), jnp.float32) * 0.1
    p["sc4"], p["sh4"] = bn_fold(ks[14], ks[15], D2)
    p["w_fc3"] = jax.random.normal(ks[16], (D3, D2), jnp.float32) * 0.1
    p["b_fc3"] = jax.random.normal(ks[17], (D3,), jnp.float32) * 0.1
    return p


# --------------------------- pure-JAX reference ------------------------------
def reference_forward(x, p):
    def relu_bn_pool(y, sc, sh):
        y = jnp.maximum(y, 0.0)
        y = y * sc[None, :, None, None] + sh[None, :, None, None]
        n, c, hh, ww = y.shape
        return y.reshape(n, c, hh // 2, 2, ww // 2, 2).max(axis=(3, 5))

    y = lax.conv_general_dilated(x, p["w_c1"], (1, 1),
                                 ((PAD1, PAD1), (PAD1, PAD1)),
                                 dimension_numbers=("NCHW", "OIHW", "NCHW"))
    y = relu_bn_pool(y + p["b_c1"][None, :, None, None], p["sc1"], p["sh1"])
    y = lax.conv_general_dilated(y, p["w_c2"], (1, 1), "VALID",
                                 dimension_numbers=("NCHW", "OIHW", "NCHW"))
    y = relu_bn_pool(y + p["b_c2"][None, :, None, None], p["sc2"], p["sh2"])
    t = y.reshape(N, -1)
    h = jnp.maximum(t @ p["w_fc1"].T + p["b_fc1"], 0.0) * p["sc3"] + p["sh3"]
    h = jnp.maximum(h @ p["w_fc2"].T + p["b_fc2"], 0.0) * p["sc4"] + p["sh4"]
    return h @ p["w_fc3"].T + p["b_fc3"]


if __name__ == "__main__":
    key = jax.random.PRNGKey(0)
    kx, kparam = jax.random.split(key)
    x = jax.random.normal(kx, (N, 1, H, W), jnp.float32)
    params = init_params(kparam)
    kparams = pack_params(params)          # one-time kernel-ready packing

    out = cnn_forward(x, kparams)
    out = jax.block_until_ready(out)

    ref = reference_forward(x, params)
    assert out.shape == (N, D3)
    # bf16 FC weights/activations loosen the tolerance slightly vs pure f32.
    np.testing.assert_allclose(np.asarray(out), np.asarray(ref),
                               rtol=3e-2, atol=3e-2)
    print("KERNEL_OK")
</pallas_src>

<mosaic_0001>
module attributes {stable_mosaic.version = 11 : i64} {
  func.func @cnn_kernel(%arg0: memref<2x1x22x18xf32, #tpu.memory_space<vmem>>, %arg1: memref<328x128xf32, #tpu.memory_space<vmem>>, %arg2: memref<4x128x128xbf16, #tpu.memory_space<vmem>>, %arg3: memref<2x128xf32, #tpu.memory_space<vmem>>, %arg4: memref<48x20xf32, #tpu.memory_space<vmem>>) attributes {dimension_semantics = [], scalar_prefetch = 0 : i64, scratch_operands = 1 : i64, tpu.core_type = #tpu.core_type<tc>} {
    %cst = arith.constant 0.000000e+00 : f32
    %0 = vector.broadcast %cst : f32 to vector<48x20xf32>
    %c0 = arith.constant 0 : index
    %c0_0 = arith.constant 0 : index
    %1 = vector.load %arg4[%c0, %c0_0] : memref<48x20xf32, #tpu.memory_space<vmem>>, vector<48x20xf32>
    tpu.vector_store %arg4[%c0, %c0_0], %0 {strides = array<i32>} : memref<48x20xf32, #tpu.memory_space<vmem>>, vector<48x20xf32>,
    %c0_1 = arith.constant 0 : index
    %c0_2 = arith.constant 0 : index
    %c0_3 = arith.constant 0 : index
    %c0_4 = arith.constant 0 : index
    %2 = vector.load %arg0[%c0_1, %c0_2, %c0_3, %c0_4] : memref<2x1x22x18xf32, #tpu.memory_space<vmem>>, vector<1x1x22x18xf32>
    %3 = vector.shape_cast %2 : vector<1x1x22x18xf32> to vector<22x18xf32>
    %c1 = arith.constant 1 : index
    %c1_5 = arith.constant 1 : index
    %4 = vector.load %arg4[%c1, %c1_5] : memref<48x20xf32, #tpu.memory_space<vmem>>, vector<22x18xf32>
    tpu.vector_store %arg4[%c1, %c1_5], %3 {strides = array<i32>} : memref<48x20xf32, #tpu.memory_space<vmem>>, vector<22x18xf32>,
    %c1_6 = arith.constant 1 : index
    %c0_7 = arith.constant 0 : index
    %c0_8 = arith.constant 0 : index
    %c0_9 = arith.constant 0 : index
    %5 = vector.load %arg0[%c1_6, %c0_7, %c0_8, %c0_9] : memref<2x1x22x18xf32, #tpu.memory_space<vmem>>, vector<1x1x22x18xf32>
    %6 = vector.shape_cast %5 : vector<1x1x22x18xf32> to vector<22x18xf32>
    %c25 = arith.constant 25 : index
    %c1_10 = arith.constant 1 : index
    %7 = vector.load %arg4[%c25, %c1_10] : memref<48x20xf32, #tpu.memory_space<vmem>>, vector<22x18xf32>
    tpu.vector_store %arg4[%c25, %c1_10], %6 {strides = array<i32>} : memref<48x20xf32, #tpu.memory_space<vmem>>, vector<22x18xf32>,
    %c0_11 = arith.constant 0 : index
    %c0_12 = arith.constant 0 : index
    %8 = vector.load %arg4[%c0_11, %c0_12] : memref<48x20xf32, #tpu.memory_space<vmem>>, vector<48x20xf32>
    %cst_13 = arith.constant 0.000000e+00 : f32
    %9 = vector.broadcast %cst_13 : f32 to vector<44x64xf32>
    %c0_14 = arith.constant 0 : index
    %c0_15 = arith.constant 0 : index
    %10 = vector.load %arg1[%c0_14, %c0_15] : memref<328x128xf32, #tpu.memory_space<vmem>>, vector<20x64xf32>
    %11 = vector.extract_strided_slice %8 {offsets = [0, 0], sizes = [44, 20], strides = [1, 1]} : vector<48x20xf32> to vector<44x20xf32>
    %cst_16 = arith.constant dense<0.000000e+00> : vector<44x64xf32>
    %12 = tpu.matmul %11, %10, %cst_16 {dimension_numbers = #tpu.dot_dimension_numbers<[1], [0], [0], [1], [0, 0, 1, 1], [], []>} : vector<44x20xf32>, vector<20x64xf32>, vector<44x64xf32> -> vector<44x64xf32>
    %13 = arith.addf %9, %12 : vector<44x64xf32>
    %c24 = arith.constant 24 : index
    %c0_17 = arith.constant 0 : index
    %14 = vector.load %arg1[%c24, %c0_17] : memref<328x128xf32, #tpu.memory_space<vmem>>, vector<20x64xf32>
    %15 = vector.extract_strided_slice %8 {offsets = [1, 0], sizes = [44, 20], strides = [1, 1]} : vector<48x20xf32> to vector<44x20xf32>
    %cst_18 = arith.constant dense<0.000000e+00> : vector<44x64xf32>
    %16 = tpu.matmul %15, %14, %cst_18 {dimension_numbers = #tpu.dot_dimension_numbers<[1], [0], [0], [1], [0, 0, 1, 1], [], []>} : vector<44x20xf32>, vector<20x64xf32>, vector<44x64xf32> -> vector<44x64xf32>
    %17 = arith.addf %13, %16 : vector<44x64xf32>
    %c48 = arith.constant 48 : index
    %c0_19 = arith.constant 0 : index
    %18 = vector.load %arg1[%c48, %c0_19] : memref<328x128xf32, #tpu.memory_space<vmem>>, vector<20x64xf32>
    %19 = vector.extract_strided_slice %8 {offsets = [2, 0], sizes = [44, 20], strides = [1, 1]} : vector<48x20xf32> to vector<44x20xf32>
    %cst_20 = arith.constant dense<0.000000e+00> : vector<44x64xf32>
    %20 = tpu.matmul %19, %18, %cst_20 {dimension_numbers = #tpu.dot_dimension_numbers<[1], [0], [0], [1], [0, 0, 1, 1], [], []>} : vector<44x20xf32>, vector<20x64xf32>, vector<44x64xf32> -> vector<44x64xf32>
    %21 = arith.addf %17, %20 : vector<44x64xf32>
    %c72 = arith.constant 72 : index
    %c0_21 = arith.constant 0 : index
    %22 = vector.load %arg1[%c72, %c0_21] : memref<328x128xf32, #tpu.memory_space<vmem>>, vector<20x64xf32>
    %23 = vector.extract_strided_slice %8 {offsets = [3, 0], sizes = [44, 20], strides = [1, 1]} : vector<48x20xf32> to vector<44x20xf32>
    %cst_22 = arith.constant dense<0.000000e+00> : vector<44x64xf32>
    %24 = tpu.matmul %23, %22, %cst_22 {dimension_numbers = #tpu.dot_dimension_numbers<[1], [0], [0], [1], [0, 0, 1, 1], [], []>} : vector<44x20xf32>, vector<20x64xf32>, vector<44x64xf32> -> vector<44x64xf32>
    %25 = arith.addf %21, %24 : vector<44x64xf32>
    %c96 = arith.constant 96 : index
    %c0_23 = arith.constant 0 : index
    %26 = vector.load %arg1[%c96, %c0_23] : memref<328x128xf32, #tpu.memory_space<vmem>>, vector<20x64xf32>
    %27 = vector.extract_strided_slice %8 {offsets = [4, 0], sizes = [44, 20], strides = [1, 1]} : vector<48x20xf32> to vector<44x20xf32>
    %cst_24 = arith.constant dense<0.000000e+00> : vector<44x64xf32>
    %28 = tpu.matmul %27, %26, %cst_24 {dimension_numbers = #tpu.dot_dimension_numbers<[1], [0], [0], [1], [0, 0, 1, 1], [], []>} : vector<44x20xf32>, vector<20x64xf32>, vector<44x64xf32> -> vector<44x64xf32>
    %29 = arith.addf %25, %28 : vector<44x64xf32>
    %c312 = arith.constant 312 : index
    %c0_25 = arith.constant 0 : index
    %30 = vector.load %arg1[%c312, %c0_25] : memref<328x128xf32, #tpu.memory_space<vmem>>, vector<1x64xf32>
    %c313 = arith.constant 313 : index
    %c0_26 = arith.constant 0 : index
    %31 = vector.load %arg1[%c313, %c0_26] : memref<328x128xf32, #tpu.memory_space<vmem>>, vector<1x64xf32>
    %c314 = arith.constant 314 : index
    %c0_27 = arith.constant 0 : index
    %32 = vector.load %arg1[%c314, %c0_27] : memref<328x128xf32, #tpu.memory_space<vmem>>, vector<1x64xf32>
    %33 = vector.broadcast %30 : vector<1x64xf32> to vector<44x64xf32>
    %34 = arith.addf %29, %33 : vector<44x64xf32>
    %cst_28 = arith.constant 0.000000e+00 : f32
    %35 = vector.broadcast %cst_28 : f32 to vector<44x64xf32>
    %36 = arith.maximumf %34, %35 : vector<44x64xf32>
    %37 = vector.broadcast %31 : vector<1x64xf32> to vector<44x64xf32>
    %38 = arith.mulf %36, %37 : vector<44x64xf32>
    %39 = vector.broadcast %32 : vector<1x64xf32> to vector<44x64xf32>
    %40 = arith.addf %38, %39 : vector<44x64xf32>
    %41 = vector.extract_strided_slice %40 {offsets = [0, 0], sizes = [43, 64], strides = [1, 1]} : vector<44x64xf32> to vector<43x64xf32>
    %42 = vector.extract_strided_slice %40 {offsets = [1, 0], sizes = [43, 64], strides = [1, 1]} : vector<44x64xf32> to vector<43x64xf32>
    %43 = arith.maximumf %41, %42 : vector<43x64xf32>
    %44 = vector.extract_strided_slice %43 {offsets = [0, 0], sizes = [43, 63], strides = [1, 1]} : vector<43x64xf32> to vector<43x63xf32>
    %45 = vector.extract_strided_slice %43 {offsets = [0, 1], sizes = [43, 63], strides = [1, 1]} : vector<43x64xf32> to vector<43x63xf32>
    %46 = arith.maximumf %44, %45 : vector<43x63xf32>
    %cst_29 = arith.constant 0.000000e+00 : f32
    %47 = vector.broadcast %cst_29 : f32 to vector<39x48xf32>
    %c120 = arith.constant 120 : index
    %c0_30 = arith.constant 0 : index
    %48 = vector.load %arg1[%c120, %c0_30] : memref<328x128xf32, #tpu.memory_space<vmem>>, vector<63x48xf32>
    %49 = vector.extract_strided_slice %46 {offsets = [0, 0], sizes = [39, 63], strides = [1, 1]} : vector<43x63xf32> to vector<39x63xf32>
    %cst_31 = arith.constant dense<0.000000e+00> : vector<39x48xf32>
    %50 = tpu.matmul %49, %48, %cst_31 {dimension_numbers = #tpu.dot_dimension_numbers<[1], [0], [0], [1], [0, 0, 1, 1], [], []>} : vector<39x63xf32>, vector<63x48xf32>, vector<39x48xf32> -> vector<39x48xf32>
    %51 = arith.addf %47, %50 : vector<39x48xf32>
    %c184 = arith.constant 184 : index
    %c0_32 = arith.constant 0 : index
    %52 = vector.load %arg1[%c184, %c0_32] : memref<328x128xf32, #tpu.memory_space<vmem>>, vector<63x48xf32>
    %53 = vector.extract_strided_slice %46 {offsets = [2, 0], sizes = [39, 63], strides = [1, 1]} : vector<43x63xf32> to vector<39x63xf32>
    %cst_33 = arith.constant dense<0.000000e+00> : vector<39x48xf32>
    %54 = tpu.matmul %53, %52, %cst_33 {dimension_numbers = #tpu.dot_dimension_numbers<[1], [0], [0], [1], [0, 0, 1, 1], [], []>} : vector<39x63xf32>, vector<63x48xf32>, vector<39x48xf32> -> vector<39x48xf32>
    %55 = arith.addf %51, %54 : vector<39x48xf32>
    %c248 = arith.constant 248 : index
    %c0_34 = arith.constant 0 : index
    %56 = vector.load %arg1[%c248, %c0_34] : memref<328x128xf32, #tpu.memory_space<vmem>>, vector<63x48xf32>
    %57 = vector.extract_strided_slice %46 {offsets = [4, 0], sizes = [39, 63], strides = [1, 1]} : vector<43x63xf32> to vector<39x63xf32>
    %cst_35 = arith.constant dense<0.000000e+00> : vector<39x48xf32>
    %58 = tpu.matmul %57, %56, %cst_35 {dimension_numbers = #tpu.dot_dimension_numbers<[1], [0], [0], [1], [0, 0, 1, 1], [], []>} : vector<39x63xf32>, vector<63x48xf32>, vector<39x48xf32> -> vector<39x48xf32>
    %59 = arith.addf %55, %58 : vector<39x48xf32>
    %c315 = arith.constant 315 : index
    %c0_36 = arith.constant 0 : index
    %60 = vector.load %arg1[%c315, %c0_36] : memref<328x128xf32, #tpu.memory_space<vmem>>, vector<1x48xf32>
    %c316 = arith.constant 316 : index
    %c0_37 = arith.constant 0 : index
    %61 = vector.load %arg1[%c316, %c0_37] : memref<328x128xf32, #tpu.memory_space<vmem>>, vector<1x48xf32>
    %c317 = arith.constant 317 : index
    %c0_38 = arith.constant 0 : index
    %62 = vector.load %arg1[%c317, %c0_38] : memref<328x128xf32, #tpu.memory_space<vmem>>, vector<1x48xf32>
    %63 = vector.broadcast %60 : vector<1x48xf32> to vector<39x48xf32>
    %64 = arith.addf %59, %63 : vector<39x48xf32>
    %cst_39 = arith.constant 0.000000e+00 : f32
    %65 = vector.broadcast %cst_39 : f32 to vector<39x48xf32>
    %66 = arith.maximumf %64, %65 : vector<39x48xf32>
    %67 = vector.broadcast %61 : vector<1x48xf32> to vector<39x48xf32>
    %68 = arith.mulf %66, %67 : vector<39x48xf32>
    %69 = vector.broadcast %62 : vector<1x48xf32> to vector<39x48xf32>
    %70 = arith.addf %68, %69 : vector<39x48xf32>
    %71 = vector.extract_strided_slice %70 {offsets = [0, 0], sizes = [37, 48], strides = [1, 1]} : vector<39x48xf32> to vector<37x48xf32>
    %72 = vector.extract_strided_slice %70 {offsets = [2, 0], sizes = [37, 48], strides = [1, 1]} : vector<39x48xf32> to vector<37x48xf32>
    %73 = arith.maximumf %71, %72 : vector<37x48xf32>
    %74 = vector.extract_strided_slice %73 {offsets = [0, 0], sizes = [37, 47], strides = [1, 1]} : vector<37x48xf32> to vector<37x47xf32>
    %75 = vector.extract_strided_slice %73 {offsets = [0, 1], sizes = [37, 47], strides = [1, 1]} : vector<37x48xf32> to vector<37x47xf32>
    %76 = arith.maximumf %74, %75 : vector<37x47xf32>
    %77 = arith.truncf %76 : vector<37x47xf32> to vector<37x47xbf16>
    %cst_40 = arith.constant 0.000000e+00 : f32
    %78 = vector.broadcast %cst_40 : f32 to vector<1x128xf32>
    %cst_41 = arith.constant 0.000000e+00 : f32
    %79 = vector.broadcast %cst_41 : f32 to vector<1x128xf32>
    %c0_42 = arith.constant 0 : index
    %c0_43 = arith.constant 0 : index
    %c0_44 = arith.constant 0 : index
    %80 = vector.load %arg2[%c0_42, %c0_43, %c0_44] : memref<4x128x128xbf16, #tpu.memory_space<vmem>>, vector<1x47x128xbf16>
    %81 = vector.shape_cast %80 : vector<1x47x128xbf16> to vector<47x128xbf16>
    %82 = vector.extract_strided_slice %77 {offsets = [0, 0], sizes = [1, 47], strides = [1, 1]} : vector<37x47xbf16> to vector<1x47xbf16>
    %cst_45 = arith.constant dense<0.000000e+00> : vector<1x128xf32>
    %83 = tpu.matmul %82, %81, %cst_45 {dimension_numbers = #tpu.dot_dimension_numbers<[1], [0], [0], [1], [0, 0, 1, 1], [], []>} : vector<1x47xbf16>, vector<47x128xbf16>, vector<1x128xf32> -> vector<1x128xf32>
    %84 = arith.addf %78, %83 : vector<1x128xf32>
    %85 = vector.extract_strided_slice %77 {offsets = [24, 0], sizes = [1, 47], strides = [1, 1]} : vector<37x47xbf16> to vector<1x47xbf16>
    %cst_46 = arith.constant dense<0.000000e+00> : vector<1x128xf32>
    %86 = tpu.matmul %85, %81, %cst_46 {dimension_numbers = #tpu.dot_dimension_numbers<[1], [0], [0], [1], [0, 0, 1, 1], [], []>} : vector<1x47xbf16>, vector<47x128xbf16>, vector<1x128xf32> -> vector<1x128xf32>
    %87 = arith.addf %79, %86 : vector<1x128xf32>
    %c0_47 = arith.constant 0 : index
    %c48_48 = arith.constant 48 : index
    %c0_49 = arith.constant 0 : index
    %88 = vector.load %arg2[%c0_47, %c48_48, %c0_49] : memref<4x128x128xbf16, #tpu.memory_space<vmem>>, vector<1x47x128xbf16>
    %89 = vector.shape_cast %88 : vector<1x47x128xbf16> to vector<47x128xbf16>
    %90 = vector.extract_strided_slice %77 {offsets = [4, 0], sizes = [1, 47], strides = [1, 1]} : vector<37x47xbf16> to vector<1x47xbf16>
    %cst_50 = arith.constant dense<0.000000e+00> : vector<1x128xf32>
    %91 = tpu.matmul %90, %89, %cst_50 {dimension_numbers = #tpu.dot_dimension_numbers<[1], [0], [0], [1], [0, 0, 1, 1], [], []>} : vector<1x47xbf16>, vector<47x128xbf16>, vector<1x128xf32> -> vector<1x128xf32>
    %92 = arith.addf %84, %91 : vector<1x128xf32>
    %93 = vector.extract_strided_slice %77 {offsets = [28, 0], sizes = [1, 47], strides = [1, 1]} : vector<37x47xbf16> to vector<1x47xbf16>
    %cst_51 = arith.constant dense<0.000000e+00> : vector<1x128xf32>
    %94 = tpu.matmul %93, %89, %cst_51 {dimension_numbers = #tpu.dot_dimension_numbers<[1], [0], [0], [1], [0, 0, 1, 1], [], []>} : vector<1x47xbf16>, vector<47x128xbf16>, vector<1x128xf32> -> vector<1x128xf32>
    %95 = arith.addf %87, %94 : vector<1x128xf32>
    %c1_52 = arith.constant 1 : index
    %c0_53 = arith.constant 0 : index
    %c0_54 = arith.constant 0 : index
    %96 = vector.load %arg2[%c1_52, %c0_53, %c0_54] : memref<4x128x128xbf16, #tpu.memory_space<vmem>>, vector<1x47x128xbf16>
    %97 = vector.shape_cast %96 : vector<1x47x128xbf16> to vector<47x128xbf16>
    %98 = vector.extract_strided_slice %77 {offsets = [8, 0], sizes = [1, 47], strides = [1, 1]} : vector<37x47xbf16> to vector<1x47xbf16>
    %cst_55 = arith.constant dense<0.000000e+00> : vector<1x128xf32>
    %99 = tpu.matmul %98, %97, %cst_55 {dimension_numbers = #tpu.dot_dimension_numbers<[1], [0], [0], [1], [0, 0, 1, 1], [], []>} : vector<1x47xbf16>, vector<47x128xbf16>, vector<1x128xf32> -> vector<1x128xf32>
    %100 = arith.addf %92, %99 : vector<1x128xf32>
    %101 = vector.extract_strided_slice %77 {offsets = [32, 0], sizes = [1, 47], strides = [1, 1]} : vector<37x47xbf16> to vector<1x47xbf16>
    %cst_56 = arith.constant dense<0.000000e+00> : vector<1x128xf32>
    %102 = tpu.matmul %101, %97, %cst_56 {dimension_numbers = #tpu.dot_dimension_numbers<[1], [0], [0], [1], [0, 0, 1, 1], [], []>} : vector<1x47xbf16>, vector<47x128xbf16>, vector<1x128xf32> -> vector<1x128xf32>
    %103 = arith.addf %95, %102 : vector<1x128xf32>
    %c1_57 = arith.constant 1 : index
    %c48_58 = arith.constant 48 : index
    %c0_59 = arith.constant 0 : index
    %104 = vector.load %arg2[%c1_57, %c48_58, %c0_59] : memref<4x128x128xbf16, #tpu.memory_space<vmem>>, vector<1x47x128xbf16>
    %105 = vector.shape_cast %104 : vector<1x47x128xbf16> to vector<47x128xbf16>
    %106 = vector.extract_strided_slice %77 {offsets = [12, 0], sizes = [1, 47], strides = [1, 1]} : vector<37x47xbf16> to vector<1x47xbf16>
    %cst_60 = arith.constant dense<0.000000e+00> : vector<1x128xf32>
    %107 = tpu.matmul %106, %105, %cst_60 {dimension_numbers = #tpu.dot_dimension_numbers<[1], [0], [0], [1], [0, 0, 1, 1], [], []>} : vector<1x47xbf16>, vector<47x128xbf16>, vector<1x128xf32> -> vector<1x128xf32>
    %108 = arith.addf %100, %107 : vector<1x128xf32>
    %109 = vector.extract_strided_slice %77 {offsets = [36, 0], sizes = [1, 47], strides = [1, 1]} : vector<37x47xbf16> to vector<1x47xbf16>
    %cst_61 = arith.constant dense<0.000000e+00> : vector<1x128xf32>
    %110 = tpu.matmul %109, %105, %cst_61 {dimension_numbers = #tpu.dot_dimension_numbers<[1], [0], [0], [1], [0, 0, 1, 1], [], []>} : vector<1x47xbf16>, vector<47x128xbf16>, vector<1x128xf32> -> vector<1x128xf32>
    %111 = arith.addf %103, %110 : vector<1x128xf32>
    %112 = tpu.concatenate %108, %111 in 0 : vector<1x128xf32>, vector<1x128xf32> -> vector<2x128xf32>
    %c318 = arith.constant 318 : index
    %c0_62 = arith.constant 0 : index
    %113 = vector.load %arg1[%c318, %c0_62] : memref<328x128xf32, #tpu.memory_space<vmem>>, vector<1x128xf32>
    %114 = vector.broadcast %113 : vector<1x128xf32> to vector<2x128xf32>
    %115 = arith.addf %112, %114 : vector<2x128xf32>
    %cst_63 = arith.constant 0.000000e+00 : f32
    %116 = vector.broadcast %cst_63 : f32 to vector<2x128xf32>
    %117 = arith.maximumf %115, %116 : vector<2x128xf32>
    %c319 = arith.constant 319 : index
    %c0_64 = arith.constant 0 : index
    %118 = vector.load %arg1[%c319, %c0_64] : memref<328x128xf32, #tpu.memory_space<vmem>>, vector<1x128xf32>
    %119 = vector.broadcast %118 : vector<1x128xf32> to vector<2x128xf32>
    %120 = arith.mulf %117, %119 : vector<2x128xf32>
    %c320 = arith.constant 320 : index
    %c0_65 = arith.constant 0 : index
    %121 = vector.load %arg1[%c320, %c0_65] : memref<328x128xf32, #tpu.memory_space<vmem>>, vector<1x128xf32>
    %122 = vector.broadcast %121 : vector<1x128xf32> to vector<2x128xf32>
    %123 = arith.addf %120, %122 : vector<2x128xf32>
    %124 = arith.truncf %123 : vector<2x128xf32> to vector<2x128xbf16>
    %c2 = arith.constant 2 : index
    %c0_66 = arith.constant 0 : index
    %c0_67 = arith.constant 0 : index
    %125 = vector.load %arg2[%c2, %c0_66, %c0_67] : memref<4x128x128xbf16, #tpu.memory_space<vmem>>, vector<1x128x128xbf16>
    %126 = vector.shape_cast %125 : vector<1x128x128xbf16> to vector<128x128xbf16>
    %cst_68 = arith.constant dense<0.000000e+00> : vector<2x128xf32>
    %127 = tpu.matmul %124, %126, %cst_68 {dimension_numbers = #tpu.dot_dimension_numbers<[1], [0], [0], [1], [0, 0, 1, 1], [], []>} : vector<2x128xbf16>, vector<128x128xbf16>, vector<2x128xf32> -> vector<2x128xf32>
    %c321 = arith.constant 321 : index
    %c0_69 = arith.constant 0 : index
    %128 = vector.load %arg1[%c321, %c0_69] : memref<328x128xf32, #tpu.memory_space<vmem>>, vector<1x128xf32>
    %129 = vector.broadcast %128 : vector<1x128xf32> to vector<2x128xf32>
    %130 = arith.addf %127, %129 : vector<2x128xf32>
    %cst_70 = arith.constant 0.000000e+00 : f32
    %131 = vector.broadcast %cst_70 : f32 to vector<2x128xf32>
    %132 = arith.maximumf %130, %131 : vector<2x128xf32>
    %c322 = arith.constant 322 : index
    %c0_71 = arith.constant 0 : index
    %133 = vector.load %arg1[%c322, %c0_71] : memref<328x128xf32, #tpu.memory_space<vmem>>, vector<1x128xf32>
    %134 = vector.broadcast %133 : vector<1x128xf32> to vector<2x128xf32>
    %135 = arith.mulf %132, %134 : vector<2x128xf32>
    %c323 = arith.constant 323 : index
    %c0_72 = arith.constant 0 : index
    %136 = vector.load %arg1[%c323, %c0_72] : memref<328x128xf32, #tpu.memory_space<vmem>>, vector<1x128xf32>
    %137 = vector.broadcast %136 : vector<1x128xf32> to vector<2x128xf32>
    %138 = arith.addf %135, %137 : vector<2x128xf32>
    %139 = arith.truncf %138 : vector<2x128xf32> to vector<2x128xbf16>
    %c3 = arith.constant 3 : index
    %c0_73 = arith.constant 0 : index
    %c0_74 = arith.constant 0 : index
    %140 = vector.load %arg2[%c3, %c0_73, %c0_74] : memref<4x128x128xbf16, #tpu.memory_space<vmem>>, vector<1x128x128xbf16>
    %141 = vector.shape_cast %140 : vector<1x128x128xbf16> to vector<128x128xbf16>
    %cst_75 = arith.constant dense<0.000000e+00> : vector<2x128xf32>
    %142 = tpu.matmul %139, %141, %cst_75 {dimension_numbers = #tpu.dot_dimension_numbers<[1], [0], [0], [1], [0, 0, 1, 1], [], []>} : vector<2x128xbf16>, vector<128x128xbf16>, vector<2x128xf32> -> vector<2x128xf32>
    %c324 = arith.constant 324 : index
    %c0_76 = arith.constant 0 : index
    %143 = vector.load %arg1[%c324, %c0_76] : memref<328x128xf32, #tpu.memory_space<vmem>>, vector<1x128xf32>
    %144 = vector.broadcast %143 : vector<1x128xf32> to vector<2x128xf32>
    %145 = arith.addf %142, %144 : vector<2x128xf32>
    %c0_77 = arith.constant 0 : index
    %c0_78 = arith.constant 0 : index
    %146 = vector.load %arg3[%c0_77, %c0_78] : memref<2x128xf32, #tpu.memory_space<vmem>>, vector<2x128xf32>
    tpu.vector_store %arg3[%c0_77, %c0_78], %145 {strides = array<i32>} : memref<2x128xf32, #tpu.memory_space<vmem>>, vector<2x128xf32>,
    return
  }
}

</mosaic_0001>

<bundles_post_ra>
// kernel: cnn_forward.1
= control target key start
LH: loop header
LB: loop body
LE: loop exit
PB: predicated region body
PF: predicated region fallthrough
CT: control target
= control target key end

     0   :  { %8 = vsyncpa [#allocation4], 0  ;;  %s3193_s0 = inlined_call_operand.vmem [shape: f32[2,1,22,18], index: 0, kind: input, shape index: {}]   ;;  %s3194_s1 = inlined_call_operand.hbm [shape: f32[328,128], index: 1, kind: input, shape index: {}]   ;;  %s3195_s2 = inlined_call_operand.hbm [shape: bf16[4,128,128], index: 2, kind: input, shape index: {}]   ;;  %s3196_s3 = inlined_call_operand.hbm [shape: f32[2,128], index: 3, kind: output, shape index: {}]  }
   0x1   :  { %9 = vsyncpa [#allocation7], 0 }
   0x2   :  { %10 = vsyncpa [#allocation5], 0  ;;  %s2785_s12 = smov [#allocation3]   ;;  %s2713_s16 = scalar_lea.hbm %s3194_s1, 5248 }
   0x3   :  { %s18_s13 = sshll.u32 %s2785_s12, 4  ;;  %p2714_p0 = scmp.ne.s32.totalorder %s3194_s1, %s2713_s16  ;;  %s19_s13 = int_to_ptr.vmem [resolvable:$true] %s18_s13 }
   0x4   :  { %p2717_p1 = scmp.lt.u32.totalorder %s2713_s16, %s3194_s1 }
   0x6   :  { %p2719_p2 = pnand %p2717_p1, %p2714_p0 }
   0x8   :  { %2722 = shalt.err (!%p2719_p2)
}
   0x9   :  { %s2723_s21 = scalar_lea.vmem %s19_s13, 5248  ;;  %p2728_p4 = scmp.lt.s32.totalorder %s19_s13, %s19_s13 }
   0xa   :  { %p2724_p3 = scmp.ne.s32.totalorder %s19_s13, %s2723_s21  ;;  %p2729_p5 = scmp.lt.s32.totalorder %s2723_s21, %s2723_s21 }
   0xc   :  { %p2730_p6 = por %p2729_p5, %p2728_p4 }
   0xe   :  { %p2731_p7 = pnand %p2730_p6, %p2724_p3 }
  0x10   :  { %2734 = shalt.err (!%p2731_p7)
}
  0x11   :  { %s2786_s22 = smov 128   ;;  %s2787_s23 = smov 8  }
  0x12   :  { %24 = dma.hbm_to_vmem [thread:$0]  %s3194_s1, 5248, %s19_s13, [#allocation4], %s2786_s22, %s2786_s22, %s2787_s23  }
  0x13   :  { %s2788_s26 = smov [#allocation6]   ;;  %s2735_s30 = scalar_lea.hbm %s3195_s2, 4096 }
  0x14   :  { %s30_s27 = sshll.u32 %s2788_s26, 4  ;;  %p2736_p8 = scmp.ne.s32.totalorder %s3195_s2, %s2735_s30  ;;  %s31_s27 = int_to_ptr.vmem [resolvable:$true] %s30_s27 }
  0x15   :  { %p2739_p9 = scmp.lt.u32.totalorder %s2735_s30, %s3195_s2 }
  0x17   :  { %p2741_p10 = pnand %p2739_p9, %p2736_p8 }
  0x19   :  { %2744 = shalt.err (!%p2741_p10)
}
  0x1a   :  { %s2745_s8 = scalar_lea.vmem %s31_s27, 4096  ;;  %p2750_p12 = scmp.lt.s32.totalorder %s31_s27, %s31_s27 }
  0x1b   :  { %p2746_p11 = scmp.ne.s32.totalorder %s31_s27, %s2745_s8  ;;  %p2751_p13 = scmp.lt.s32.totalorder %s2745_s8, %s2745_s8 }
  0x1d   :  { %p2752_p0 = por %p2751_p13, %p2750_p12 }
  0x1f   :  { %p2753_p1 = pnand %p2752_p0, %p2746_p11 }
  0x21   :  { %2756 = shalt.err (!%p2753_p1)
}
  0x22   :  { %s2789_s1 = smov 64   ;;  %s2790_s9 = smov 4  }
  0x23   :  { %36 = dma.hbm_to_vmem [thread:$0]  %s3195_s2, 4096, %s31_s27, [#allocation7], %s2789_s1, %s2789_s1, %s2790_s9  }
  0x24   :  { %2779 = dma.done.wait [#allocation4], 5248  }
  0x25   :  { %2780 = vsyncadd [#allocation4], 4294962048 }
  0x26   :  { %2781 = dma.done.wait [#allocation7], 4096  }
  0x27   :  { %2782 = vsyncadd [#allocation7], 4294963200  ;;  %vm44_vm0 = vcmask 162816   ;;  %v2791_v0 = vmov 0.0   ;;  %v53_v1 = vld [vmem:[%s3193_s0 + $0x10] sm:$0x3f] }
  0x28   :  { %47 = vst.msk [vmem:[#allocation2 + $0x10] sm:$0xff] %vm44_vm0, %v2791_v0  ;;  %45 = vst.msk [vmem:[#allocation2] sm:$0xff] %vm44_vm0, %v2791_v0  ;;  %v51_v2 = vld [vmem:[%s3193_s0] sm:$0xff]  ;;  %s2792_s15 = smov 1   ;;  %v99_v3 = vld [vmem:[#allocation3 + $0x18] sm:$0xff]  ;;  %vm132_vm1 = vcmask 1043456  }
  0x29   :  { %46 = vst.msk [vmem:[#allocation2 + $0x8] sm:$0xff] %vm44_vm0, %v2791_v0  ;;  %48 = vst.msk [vmem:[#allocation2 + $0x18] sm:$0xff] %vm44_vm0, %v2791_v0  ;;  %61 = vrot.lane.b32.xlu1 %v53_v1, %s2792_s15  ;;  %57 = vrot.lane.b32.xlu0 %v51_v2, %s2792_s15  ;;  %v2027_v4 = vld [vmem:[%s3193_s0 + $0x18] sm:$0xff]  ;;  %v52_v5 = vld [vmem:[%s3193_s0 + $0x8] sm:$0xff]  ;;  %vm69_vm2 = vcmask 152584   ;;  %vm66_vm3 = vcmask 154632  }
  0x2a   :  { %49 = vst.msk [vmem:[#allocation2 + $0x20] sm:$0xff] %vm44_vm0, %v2791_v0  ;;  %50 = vst.msk [vmem:[#allocation2 + $0x28] sm:$0xff] %vm44_vm0, %v2791_v0  ;;  %v100_v6 = vld [vmem:[#allocation3 + $0x20] sm:$0xff]  ;;  %v101_v8 = vld [vmem:[#allocation3 + $0x28] sm:$0xf]  ;;  %vm108_vm4 = vcmask 1046528  }
  0x2b   :  { %v2554_v7 = vpack.c.bf16 %v100_v6, %v99_v3  ;;  %v96_v9 = vld [vmem:[#allocation3] sm:$0xff]  ;;  %v97_v10 = vld [vmem:[#allocation3 + $0x8] sm:$0xff]  ;;  %v2029_v11 = vld [vmem:[%s3193_s0 + $0x28] sm:$0x3f]  ;;  %vm344_vm5 = vcmask 1045504   ;;  %vm475_vm6 = vcmask 1044480  }
  0x2c   :  { %v2028_v12 = vld [vmem:[%s3193_s0 + $0x20] sm:$0xff]  ;;  %v2558_v13 = vpack.c.bf16 %v97_v10, %v96_v9  ;;  %v342_v34 = vld [vmem:[#allocation3 + $0x38] sm:$0xff]  ;;  %v343_v41 = vld [vmem:[#allocation3 + $0x40] sm:$0xf]  ;;  %vm2794_vm7 = vmmov 1   ;;  %vm2795_vm9 = vmmov 0  }
  0x2d   :  { %78 = vrot.lane.b32.xlu1 %v2027_v4, %s2792_s15  ;;  %59 = vrot.lane.b32.xlu0 %v52_v5, %s2792_s15  ;;  %v98_v30 = vld [vmem:[#allocation3 + $0x10] sm:$0xf]  ;;  %v472_v42 = vld [vmem:[#allocation3 + $0x48] sm:$0xff]  ;;  %v474_v52 = vld [vmem:[#allocation3 + $0x58] sm:$0xf]  ;;  %s2796_s0 = smov 127  }
  0x2e   :  { %2555 = vmatprep.subr.bf16.mxu0 %v2554_v7  ;;  %v341_v31 = vld [vmem:[#allocation3 + $0x30] sm:$0xff]  ;;  %v603_v53 = vld [vmem:[#allocation3 + $0x60] sm:$0xff]  ;;  %v604_v54 = vld [vmem:[#allocation3 + $0x68] sm:$0xff]  ;;  %2357 = vmatprep.mubr.msk.f32.mxu1 %vm2795_vm9, %v2791_v0  ;;  %vm864_vm10 = vcmask 515072   ;;  %vm1320_vm11 = vcmask 1047552   ;;  %vm1316_vm12 = vcmask 384000  }
  0x2f   :  { %2557 = vmatpush3.bf16.msra.mxu0 %v2554_v7  ;;  %v2562_v39 = vpack.c.bf16 %v342_v34, %v341_v31  ;;  %v473_v43 = vld [vmem:[#allocation3 + $0x50] sm:$0xff]  ;;  %v2570_v57 = vpack.c.bf16 %v604_v54, %v603_v53  ;;  %v2066_v31 = vld [vmem:[#allocation3 + $0x139] ss:$0 sm:$0xff]  ;;  %v2067_v34 = vld [vmem:[#allocation3 + $0x13a] ss:$0 sm:$0xff]  ;;  %vm1754_vm13 = vcmask 1040384  }
  0x30   :  { %2270 = vmatprep.subr.msk.mxu0 %vm132_vm1, %v101_v8  ;;  %v2566_v44 = vpack.c.bf16 %v473_v43, %v472_v42  ;;  %v605_v4 = vld [vmem:[#allocation3 + $0x70] sm:$0xf]  ;;  %vm2981_vm8 = vmpackc.low %vm108_vm4, %vm2794_vm7  ;;  %s2798_s24 = smov [#allocation8]  }
  0x31   :  { %82 = vrot.lane.b32.xlu1 %v2029_v11, %s2792_s15  ;;  %80 = vrot.lane.b32.xlu0 %v2028_v12, %s2792_s15  ;;  %s2017_s25 = sshll.u32 %s2798_s24, 4  ;;  %s2018_s25 = int_to_ptr.vmem [resolvable:$true] %s2017_s25 }
  0x32   :  { %s2757_s26 = scalar_lea.vmem %s2018_s25, 32  ;;  %p2762_p3 = scmp.lt.s32.totalorder %s2018_s25, %s2018_s25 }
  0x33   :  { %2271 = vmatpush3.msk.msra.mxu0 %vm132_vm1, %v101_v8  ;;  %p2758_p2 = scmp.ne.s32.totalorder %s2018_s25, %s2757_s26  ;;  %p2763_p4 = scmp.lt.s32.totalorder %s2757_s26, %s2757_s26 }
  0x34   :  { %2559 = vmatprep.subr.bf16.mxu0 %v2558_v13 }
  0x35   :  { %p2764_p5 = por %p2763_p4, %p2762_p3 }
  0x37   :  { %p2765_p6 = pnand %p2764_p5, %p2758_p2 }
  0x9b   :  { %v62_v14 = vpop.permute.xlu1 %61  ;;  %v58_v15 = vpop.permute.xlu0 %57 }
  0x9c   :  { %70 = vst.msk [vmem:[#allocation2 + $0x11] sm:$0x3f] %vm69_vm2, %v62_v14 }
  0x9d   :  { %67 = vst.msk [vmem:[#allocation2 + $0x1] sm:$0xff] %vm66_vm3, %v58_v15 }
  0x9f   :  { %v79_v16 = vpop.permute.xlu1 %78  ;;  %v60_v17 = vpop.permute.xlu0 %59 }
  0xa0   :  { %87 = vst.msk [vmem:[#allocation2 + $0x19] sm:$0xff] %vm66_vm3, %v79_v16  ;;  %68 = vst.msk [vmem:[#allocation2 + $0x9] sm:$0xff] %vm66_vm3, %v60_v17 }
  0xa3   :  { %v83_v18 = vpop.permute.xlu1 %82  ;;  %v81_v19 = vpop.permute.xlu0 %80 }
  0xa4   :  { %89 = vst.msk [vmem:[#allocation2 + $0x29] sm:$0x3f] %vm69_vm2, %v83_v18  ;;  %v2875_v20 = vld [vmem:[#allocation2] sm:$0xff] }
  0xa5   :  { %88 = vst.msk [vmem:[#allocation2 + $0x21] sm:$0xff] %vm66_vm3, %v81_v19  ;;  %v109_v24 = vrot.slane %v2875_v20, 1  ;;  %v345_v46 = vrot.slane %v2875_v20, 2  ;;  %v476_v61 = vrot.slane %v2875_v20, 3  ;;  %v606_v10 = vrot.slane %v2875_v20, 4 }
  0xa7   :  { %v2877_v21 = vld [vmem:[#allocation2 + $0x8] sm:$0xff]  ;;  %v2879_v22 = vld [vmem:[#allocation2 + $0x10] sm:$0xff]  ;;  %v2881_v23 = vld [vmem:[#allocation2 + $0x18] sm:$0xff] }
  0xa8   :  { %v110_v25 = vrot.slane %v2877_v21, 1  ;;  %v112_v26 = vrot.slane %v2879_v22, 1  ;;  %v114_v27 = vrot.slane %v2881_v23, 1  ;;  %v346_v45 = vrot.slane %v2877_v21, 2 }
  0xa9   :  { %v348_v47 = vrot.slane %v2879_v22, 2  ;;  %v350_v49 = vrot.slane %v2881_v23, 2  ;;  %v477_v60 = vrot.slane %v2877_v21, 3  ;;  %v479_v62 = vrot.slane %v2879_v22, 3 }
  0xaa   :  { %v111_v28 = vsel %vm108_vm4, %v109_v24, %v110_v25  ;;  %v113_v29 = vsel %vm108_vm4, %v110_v25, %v112_v26  ;;  %v115_v35 = vsel %vm108_vm4, %v112_v26, %v114_v27  ;;  %v347_v48 = vsel %vm344_vm5, %v345_v46, %v346_v45  ;;  %v842_v25 = vld [vmem:[#allocation3 + $0xd0] sm:$0xff] }
  0xab   :  { %2272 = vmatprep.mubr.msk.f32.mxu0 %vm44_vm0, %v111_v28  ;;  %v349_v50 = vsel %vm344_vm5, %v346_v45, %v348_v47  ;;  %v351_v55 = vsel %vm344_vm5, %v348_v47, %v350_v49  ;;  %v478_v63 = vsel %vm475_vm6, %v476_v61, %v477_v60  ;;  %v481_v1 = vrot.slane %v2881_v23, 3 }
  0xac   :  { %v2890_v32 = vld [vmem:[#allocation2 + $0x20] sm:$0xff]  ;;  %v2892_v33 = vld [vmem:[#allocation2 + $0x28] sm:$0xff]  ;;  %2273 = vmatmul.mubr.msk.f32.vlgmr.msra.gmra.mrb[0].mxu0 %vm44_vm0, %v113_v29  ;;  %v480_v2 = vsel %vm475_vm6, %v477_v60, %v479_v62  ;;  %v607_v9 = vrot.slane %v2877_v21, 4  ;;  %v609_v11 = vrot.slane %v2879_v22, 4 }
  0xad   :  { %v116_v36 = vrot.slane %v2890_v32, 1  ;;  %v118_v37 = vrot.slane %v2892_v33, 1  ;;  %2561 = vmatpush3.bf16.msra.mxu0 %v2558_v13  ;;  %2275 = vmatprep.mubr.msk.f32.mxu0 %vm44_vm0, %v115_v35  ;;  %v352_v51 = vrot.slane %v2890_v32, 2  ;;  %v354_v56 = vrot.slane %v2892_v33, 2 }
  0xae   :  { %2285 = vmatprep.subr.msk.mxu0 %vm132_vm1, %v98_v30  ;;  %v483_v3 = vrot.slane %v2890_v32, 3  ;;  %v482_v5 = vsel %vm475_vm6, %v479_v62, %v481_v1  ;;  %v485_v6 = vrot.slane %v2892_v33, 3  ;;  %v608_v12 = vsel %vm132_vm1, %v606_v10, %v607_v9 }
  0xaf   :  { %v117_v38 = vsel %vm108_vm4, %v114_v27, %v116_v36  ;;  %v119_v40 = vsel %vm108_vm4, %v116_v36, %v118_v37  ;;  %v353_v58 = vsel %vm344_vm5, %v350_v49, %v352_v51  ;;  %v355_v59 = vsel %vm344_vm5, %v352_v51, %v354_v56  ;;  %v2065_v27 = vld [vmem:[#allocation3 + $0x138] ss:$0 sm:$0xff]  ;;  %v846_v51 = vld [vmem:[#allocation3 + $0xf0] sm:$0x7f] }
  0xb0   :  { %2276 = vmatmul.mubr.msk.f32.gmra.mrb[2].mxu0 %vm44_vm0, %v117_v38  ;;  %v484_v7 = vsel %vm475_vm6, %v481_v1, %v483_v3  ;;  %v486_v8 = vsel %vm475_vm6, %v483_v3, %v485_v6  ;;  %v611_v13 = vrot.slane %v2881_v23, 4  ;;  %v610_v14 = vsel %vm132_vm1, %v607_v9, %v609_v11  ;;  %v844_v38 = vld [vmem:[#allocation3 + $0xe0] sm:$0xff] }
  0xb1   :  { %2278 = vmatprep.mubr.msk.f32.mxu0 %vm44_vm0, %v119_v40  ;;  %2286 = vmatpush3.msk.msra.mxu0 %vm132_vm1, %v98_v30  ;;  %v613_v15 = vrot.slane %v2890_v32, 4  ;;  %v615_v17 = vrot.slane %v2892_v33, 4 }
  0xb2   :  { %2563 = vmatprep.subr.bf16.mxu0 %v2562_v39  ;;  %v612_v16 = vsel %vm132_vm1, %v609_v11, %v611_v13 }
  0xb3   :  { %v614_v18 = vsel %vm132_vm1, %v611_v13, %v613_v15  ;;  %v616_v19 = vsel %vm132_vm1, %v613_v15, %v615_v17 }
  0xb4   :  { %2279 = vmatmul.mubr.msk.f32.gmra.mrb[4].mxu0 %vm44_vm0, %v118_v37  ;;  %v843_v37 = vld [vmem:[#allocation3 + $0xd8] sm:$0xff] }
  0xb5   :  { %2287 = vmatprep.mubr.msk.f32.mxu0 %vm44_vm0, %v2875_v20  ;;  %v839_v20 = vld [vmem:[#allocation3 + $0xb8] sm:$0xff]  ;;  %v2581_v42 = vpack.c.bf16 %v844_v38, %v843_v37 }
  0xb8   :  { %2288 = vmatmul.mubr.msk.f32.vlgmr.msra.gmra.mrb[0].mxu0 %vm44_vm0, %v2877_v21  ;;  %v840_v21 = vld [vmem:[#allocation3 + $0xc0] sm:$0xff] }
  0xb9   :  { %2565 = vmatpush3.bf16.msra.mxu0 %v2562_v39  ;;  %2290 = vmatprep.mubr.msk.f32.mxu0 %vm44_vm0, %v2879_v22  ;;  %v841_v22 = vld [vmem:[#allocation3 + $0xc8] sm:$0xff]  ;;  %v2575_v24 = vpack.c.bf16 %v840_v21, %v839_v20 }
  0xba   :  { %2300 = vmatprep.subr.msk.mxu0 %vm132_vm1, %v343_v41  ;;  %v2578_v26 = vpack.c.bf16 %v842_v25, %v841_v22 }
  0xbc   :  { %2291 = vmatmul.mubr.msk.f32.gmra.mrb[2].mxu0 %vm44_vm0, %v2881_v23  ;;  %v2793_v23 = vmov 0.0|0.0  }
  0xbd   :  { %2293 = vmatprep.mubr.msk.f32.mxu0 %vm44_vm0, %v2890_v32  ;;  %2301 = vmatpush3.msk.msra.mxu0 %vm132_vm1, %v343_v41 }
  0xbe   :  { %2567 = vmatprep.subr.bf16.mxu0 %v2566_v44  ;;  %2574 = vmatprep.subr.bf16.mxu1 %v2793_v23 }
  0xbf   :  { %2576 = vmatpush3.bf16.msra.mxu1 %v2575_v24 }
  0xc0   :  { %2294 = vmatmul.mubr.msk.f32.gmra.mrb[4].mxu0 %vm44_vm0, %v2892_v33  ;;  %2577 = vmatprep.subr.bf16.mxu1 %v2793_v23 }
  0xc1   :  { %2302 = vmatprep.mubr.msk.f32.mxu0 %vm44_vm0, %v347_v48 }
  0xc3   :  { %2579 = vmatpush3.bf16.msra.mxu1 %v2578_v26  ;;  %v831_v26 = vld [vmem:[#allocation3 + $0x78] sm:$0xff] }
  0xc4   :  { %2303 = vmatmul.mubr.msk.f32.vlgmr.msra.gmra.mrb[0].mxu0 %vm44_vm0, %v349_v50  ;;  %2580 = vmatprep.subr.bf16.mxu1 %v2793_v23  ;;  %v845_v50 = vld [vmem:[#allocation3 + $0xe8] sm:$0xff] }
  0xc5   :  { %2569 = vmatpush3.bf16.msra.mxu0 %v2566_v44  ;;  %2305 = vmatprep.mubr.msk.f32.mxu0 %vm44_vm0, %v351_v55 }
  0xc6   :  { %2315 = vmatprep.subr.msk.mxu0 %vm132_vm1, %v474_v52 }
  0xc7   :  { %2582 = vmatpush3.bf16.msra.mxu1 %v2581_v42  ;;  %v836_v42 = vld [vmem:[#allocation3 + $0xa0] sm:$0xff] }
  0xc8   :  { %2306 = vmatmul.mubr.msk.f32.gmra.mrb[2].mxu0 %vm44_vm0, %v353_v58  ;;  %2583 = vmatprep.subr.bf16.mxu1 %v2793_v23 }
  0xc9   :  { %2308 = vmatprep.mubr.msk.f32.mxu0 %vm44_vm0, %v355_v59  ;;  %2316 = vmatpush3.msk.msra.mxu0 %vm132_vm1, %v474_v52 }
  0xca   :  { %2571 = vmatprep.subr.bf16.mxu0 %v2570_v57 }
  0xcc   :  { %2309 = vmatmul.mubr.msk.f32.gmra.mrb[4].mxu0 %vm44_vm0, %v354_v56  ;;  %v2584_v56 = vpack.c.bf16 %v846_v51, %v845_v50 }
  0xcd   :  { %2317 = vmatprep.mubr.msk.f32.mxu0 %vm44_vm0, %v478_v63 }
  0xce   :  { %2586 = vmatpush3.bf16.msk.msra.mxu1 %vm2981_vm8, %v2584_v56  ;;  %v1071_v56 = vld [vmem:[#allocation3 + $0xf8] sm:$0xff] }
  0xcf   :  { %2587 = vmatprep.subr.bf16.mxu1 %v2793_v23 }
  0xd0   :  { %2318 = vmatmul.mubr.msk.f32.vlgmr.msra.gmra.mrb[0].mxu0 %vm44_vm0, %v480_v2 }
  0xd1   :  { %2573 = vmatpush3.bf16.msra.mxu0 %v2570_v57  ;;  %2320 = vmatprep.mubr.msk.f32.mxu0 %vm44_vm0, %v482_v5 }
  0xd2   :  { %2330 = vmatprep.subr.msk.mxu0 %vm132_vm1, %v605_v4 }
  0xd4   :  { %2321 = vmatmul.mubr.msk.f32.gmra.mrb[2].mxu0 %vm44_vm0, %v484_v7 }
  0xd5   :  { %2323 = vmatprep.mubr.msk.f32.mxu0 %vm44_vm0, %v486_v8  ;;  %2331 = vmatpush3.msk.msra.mxu0 %vm132_vm1, %v605_v4 }
  0xd6   :  { %2434 = vmatprep.subr.bf16.mxu0 %v2791_v0 }
  0xd8   :  { %2324 = vmatmul.mubr.msk.f32.gmra.mrb[4].mxu0 %vm44_vm0, %v485_v6 }
  0xd9   :  { %2332 = vmatprep.mubr.msk.f32.mxu0 %vm44_vm0, %v608_v12 }
  0xdc   :  { %2333 = vmatmul.mubr.msk.f32.vlgmr.msra.gmra.mrb[0].mxu0 %vm44_vm0, %v610_v14 }
  0xdd   :  { %2335 = vmatprep.mubr.msk.f32.mxu0 %vm44_vm0, %v612_v16 }
  0xe0   :  { %2336 = vmatmul.mubr.msk.f32.gmra.mrb[2].mxu0 %vm44_vm0, %v614_v18 }
  0xe1   :  { %2338 = vmatprep.mubr.msk.f32.mxu0 %vm44_vm0, %v616_v19 }
  0xe4   :  { %2339 = vmatmul.mubr.msk.f32.gmra.mrb[4].mxu0 %vm44_vm0, %v615_v17 }
  0xe5   :  { %2440 = vmatprep.mubr.msk.bf16.mxu0 %vm2795_vm9, %v2791_v0 }
 0x1af   :  { %v2334_v28 = vpop.f32.mrb[0].mxu0 }
 0x1b0   :  { %v741_v29 = vadd.f32 %v2334_v28, %v2065_v27  ;;  %v698_v30 = vpop.f32.mrb[1].mxu0 }
 0x1b1   :  { %v740_v32 = vadd.f32 %v2065_v27, %v698_v30 }
 0x1b2   :  { %v747_v33 = vmax.f32 %v741_v29, 0.0 }
 0x1b3   :  { %v746_v35 = vmax.f32 %v740_v32, 0.0  ;;  %v2337_v36 = vpop.f32.mrb[2].mxu0 }
 0x1b4   :  { %v757_v39 = vmul.f32 %v2066_v31, %v747_v33  ;;  %v743_v40 = vadd.f32 %v2337_v36, %v2065_v27  ;;  %v708_v41 = vpop.f32.mrb[3].mxu0 }
 0x1b5   :  { %v756_v43 = vmul.f32 %v2066_v31, %v746_v35  ;;  %v742_v44 = vadd.f32 %v2065_v27, %v708_v41  ;;  %v834_v35 = vld [vmem:[#allocation3 + $0x90] sm:$0xff]  ;;  %v835_v41 = vld [vmem:[#allocation3 + $0x98] sm:$0xff] }
 0x1b6   :  { %v767_v45 = vadd.f32 %v2067_v34, %v757_v39  ;;  %v749_v46 = vmax.f32 %v743_v40, 0.0 }
 0x1b7   :  { %v766_v47 = vadd.f32 %v2067_v34, %v756_v43  ;;  %v748_v48 = vmax.f32 %v742_v44, 0.0  ;;  %v2340_v49 = vpop.f32.mrb[4].mxu0 }
 0x1b8   :  { %v779_v52 = vrot.slane %v767_v45, 1  ;;  %v759_v53 = vmul.f32 %v2066_v31, %v749_v46  ;;  %v745_v54 = vadd.f32 %v2340_v49, %v2065_v27  ;;  %v718_v55 = vpop.f32.mrb[5].mxu0  ;;  %v838_v49 = vld [vmem:[#allocation3 + $0xb0] sm:$0x7f] }
 0x1b9   :  { %v778_v58 = vrot.slane %v766_v47, 1  ;;  %v758_v59 = vmul.f32 %v2066_v31, %v748_v48  ;;  %v744_v60 = vadd.f32 %v2065_v27, %v718_v55  ;;  %v832_v27 = vld [vmem:[#allocation3 + $0x80] sm:$0xff]  ;;  %v837_v48 = vld [vmem:[#allocation3 + $0xa8] sm:$0xff] }
 0x1ba   :  { %v769_v61 = vadd.f32 %v2067_v34, %v759_v53  ;;  %v751_v62 = vmax.f32 %v745_v54, 0.0  ;;  %v2588_v32 = vpack.c.bf16 %v832_v27, %v831_v26  ;;  %v2597_v53 = vpack.c.bf16 %v838_v49, %v837_v48  ;;  %v2087_v48 = vld [vmem:[#allocation3 + $0x13c] ss:$0 sm:$0xff] }
 0x1bb   :  { %v768_v63 = vadd.f32 %v2067_v34, %v758_v59  ;;  %v750_v1 = vmax.f32 %v744_v60, 0.0  ;;  %v780_v2 = vsel %vm108_vm4, %v778_v58, %v779_v52  ;;  %v1072_v58 = vld [vmem:[#allocation3 + $0x100] sm:$0xff] }
 0x1bc   :  { %v783_v3 = vrot.slane %v769_v61, 1  ;;  %v761_v4 = vmul.f32 %v2066_v31, %v751_v62  ;;  %v795_v5 = vmax.f32 %v766_v47, %v780_v2  ;;  %v2594_v47 = vpack.c.bf16 %v836_v42, %v835_v41  ;;  %v1074_v62 = vld [vmem:[#allocation3 + $0x110] sm:$0xff]  ;;  %v1076_v2 = vld [vmem:[#allocation3 + $0x120] sm:$0xff] }
 0x1bd   :  { %v781_v6 = vrot.slane %v768_v63, 1  ;;  %v760_v7 = vmul.f32 %v2066_v31, %v750_v1  ;;  %v2601_v60 = vpack.c.bf16 %v1072_v58, %v1071_v56  ;;  %v1075_v1 = vld [vmem:[#allocation3 + $0x118] sm:$0xff] }
 0x1be   :  { %v771_v8 = vadd.f32 %v2067_v34, %v761_v4  ;;  %807 = vrot.lane.b32.xlu0 %v795_v5, %s2796_s0  ;;  %v1077_v4 = vld [vmem:[#allocation3 + $0x128] sm:$0xff] }
 0x1bf   :  { %v770_v9 = vadd.f32 %v2067_v34, %v760_v7  ;;  %v784_v10 = vsel %vm108_vm4, %v781_v6, %v783_v3  ;;  %v782_v11 = vsel %vm108_vm4, %v779_v52, %v781_v6  ;;  %v833_v34 = vld [vmem:[#allocation3 + $0x88] sm:$0xff] }
 0x1c0   :  { %v787_v12 = vrot.slane %v771_v8, 1  ;;  %v797_v13 = vmax.f32 %v768_v63, %v784_v10  ;;  %v796_v14 = vmax.f32 %v767_v45, %v782_v11  ;;  %v2591_v40 = vpack.c.bf16 %v834_v35, %v833_v34 }
 0x1c1   :  { %v785_v15 = vrot.slane %v770_v9, 1 }
 0x1c2   :  { %811 = vrot.lane.b32.xlu0 %v797_v13, %s2796_s0  ;;  %809 = vrot.lane.b32.xlu1 %v796_v14, %s2796_s0  ;;  %v800_v20 = vmax.f32 %v771_v8, %v787_v12 }
 0x1c3   :  { %v788_v16 = vsel %vm108_vm4, %v785_v15, %v787_v12  ;;  %v786_v17 = vsel %vm108_vm4, %v783_v3, %v785_v15  ;;  %v2607_v3 = vpack.c.bf16 %v1076_v2, %v1075_v1 }
 0x1c4   :  { %v799_v18 = vmax.f32 %v770_v9, %v788_v16  ;;  %v798_v19 = vmax.f32 %v769_v61, %v786_v17  ;;  %v1073_v61 = vld [vmem:[#allocation3 + $0x108] sm:$0xff]  ;;  %v2685_v16 = vld [vmem:[#allocation6 + $0x18] sm:$0xff]  }
 0x1c5   :  { %v2604_v63 = vpack.c.bf16 %v1074_v62, %v1073_v61  ;;  %2435 = vmatpush3.bf16.msra.mxu0 %v2685_v16 }
 0x1c6   :  { %815 = vrot.lane.b32.xlu0 %v799_v18, %s2796_s0  ;;  %813 = vrot.lane.b32.xlu1 %v798_v19, %s2796_s0 }
 0x1c7   :  { %2436 = vmatprep.subr.bf16.mxu0 %v2791_v0 }
 0x1ca   :  { %817 = vrot.lane.b32.xlu1 %v800_v20, %s2796_s0 }
 0x230   :  { %v808_v21 = vpop.permute.xlu0 %807 }
 0x231   :  { %v3003_v22 = vmax.f32 %v795_v5, %v808_v21  ;;  %v1078_v5 = vld [vmem:[#allocation3 + $0x130] sm:$0x7f] }
 0x232   :  { %v2610_v6 = vpack.c.bf16 %v1078_v5, %v1077_v4 }
 0x233   :  { %v853_v30 = vrot.slane %v3003_v22, 2  ;;  %v1079_v8 = vrot.slane %v3003_v22, 4 }
 0x234   :  { %v812_v24 = vpop.permute.xlu0 %811  ;;  %v810_v25 = vpop.permute.xlu1 %809 }
 0x235   :  { %v3005_v28 = vmax.f32 %v797_v13, %v812_v24  ;;  %v3007_v29 = vmax.f32 %v796_v14, %v810_v25 }
 0x237   :  { %v854_v31 = vrot.slane %v3007_v29, 2  ;;  %v856_v36 = vrot.slane %v3005_v28, 2  ;;  %v1080_v7 = vrot.slane %v3007_v29, 4 }
 0x238   :  { %v814_v33 = vpop.permute.xlu1 %813  ;;  %v816_v39 = vpop.permute.xlu0 %815 }
 0x239   :  { %v3012_v37 = vmax.f32 %v798_v19, %v814_v33  ;;  %v855_v38 = vsel %vm344_vm5, %v853_v30, %v854_v31  ;;  %v3019_v43 = vmax.f32 %v799_v18, %v816_v39  ;;  %v857_v45 = vsel %vm344_vm5, %v854_v31, %v856_v36 }
 0x23a   :  { %2358 = vmatmul.mubr.msk.f32.vlgmr.msra.gmra.mrb[0].mxu1 %vm864_vm10, %v855_v38  ;;  %v1081_v9 = vsel %vm132_vm1, %v1079_v8, %v1080_v7 }
 0x23b   :  { %2589 = vmatpush3.bf16.msra.mxu1 %v2588_v32  ;;  %2360 = vmatprep.mubr.msk.f32.mxu1 %vm2795_vm9, %v2791_v0  ;;  %v858_v44 = vrot.slane %v3012_v37, 2  ;;  %v860_v50 = vrot.slane %v3019_v43, 2  ;;  %v1084_v57 = vrot.slane %v3012_v37, 4  ;;  %v1086_v11 = vrot.slane %v3019_v43, 4 }
 0x23c   :  { %2590 = vmatprep.subr.bf16.mxu1 %v2793_v23  ;;  %v818_v46 = vpop.permute.xlu1 %817 }
 0x23d   :  { %v3028_v51 = vmax.f32 %v800_v20, %v818_v46  ;;  %v859_v52 = vsel %vm344_vm5, %v856_v36, %v858_v44  ;;  %v861_v55 = vsel %vm344_vm5, %v858_v44, %v860_v50  ;;  %v1087_v14 = vsel %vm132_vm1, %v1084_v57, %v1086_v11  ;;  %v2086_v44 = vld [vmem:[#allocation3 + $0x13b] ss:$0 sm:$0xff] }
 0x23e   :  { %2361 = vmatmul.mubr.msk.f32.gmra.mrb[2].mxu1 %vm864_vm10, %v857_v45 }
 0x23f   :  { %2592 = vmatpush3.bf16.msra.mxu1 %v2591_v40  ;;  %2363 = vmatprep.mubr.msk.f32.mxu1 %vm2795_vm9, %v2791_v0  ;;  %v862_v54 = vrot.slane %v3028_v51, 2  ;;  %v1088_v13 = vrot.slane %v3028_v51, 4 }
 0x240   :  { %2593 = vmatprep.subr.bf16.mxu1 %v2793_v23 }
 0x241   :  { %v863_v59 = vsel %vm344_vm5, %v860_v50, %v862_v54  ;;  %v1089_v15 = vsel %vm132_vm1, %v1086_v11, %v1088_v13 }
 0x242   :  { %2364 = vmatmul.mubr.msk.f32.gmra.mrb[4].mxu1 %vm864_vm10, %v859_v52 }
 0x243   :  { %2595 = vmatpush3.bf16.msra.mxu1 %v2594_v47  ;;  %2366 = vmatprep.mubr.msk.f32.mxu1 %vm2795_vm9, %v2791_v0 }
 0x244   :  { %2596 = vmatprep.subr.bf16.mxu1 %v2793_v23 }
 0x246   :  { %2367 = vmatmul.mubr.msk.f32.gmra.mrb[6].mxu1 %vm864_vm10, %v861_v55  ;;  %v2088_v55 = vld [vmem:[#allocation3 + $0x13d] ss:$0 sm:$0xff] }
 0x247   :  { %2369 = vmatprep.mubr.msk.f32.mxu1 %vm2795_vm9, %v2791_v0  ;;  %2599 = vmatpush3.bf16.msk.msra.mxu1 %vm2981_vm8, %v2597_v53 }
 0x248   :  { %2600 = vmatprep.subr.bf16.mxu1 %v2793_v23 }
 0x24a   :  { %2370 = vmatmul.mubr.msk.f32.gmra.mrb[8].mxu1 %vm864_vm10, %v863_v59 }
 0x24b   :  { %2388 = vmatprep.mubr.msk.f32.mxu1 %vm2795_vm9, %v2791_v0 }
 0x24e   :  { %2389 = vmatmul.mubr.msk.f32.vlgmr.msra.gmra.mrb[10].mxu1 %vm864_vm10, %v3003_v22 }
 0x24f   :  { %2602 = vmatpush3.bf16.msra.mxu1 %v2601_v60  ;;  %2391 = vmatprep.mubr.msk.f32.mxu1 %vm2795_vm9, %v2791_v0 }
 0x250   :  { %2603 = vmatprep.subr.bf16.mxu1 %v2793_v23 }
 0x252   :  { %2392 = vmatmul.mubr.msk.f32.gmra.mrb[12].mxu1 %vm864_vm10, %v3007_v29 }
 0x253   :  { %2605 = vmatpush3.bf16.msra.mxu1 %v2604_v63  ;;  %2394 = vmatprep.mubr.msk.f32.mxu1 %vm2795_vm9, %v2791_v0 }
 0x254   :  { %2606 = vmatprep.subr.bf16.mxu1 %v2793_v23 }
 0x256   :  { %2395 = vmatmul.mubr.msk.f32.gmra.mrb[14].mxu1 %vm864_vm10, %v3005_v28 }
 0x257   :  { %2608 = vmatpush3.bf16.msra.mxu1 %v2607_v3  ;;  %2397 = vmatprep.mubr.msk.f32.mxu1 %vm2795_vm9, %v2791_v0 }
 0x258   :  { %2609 = vmatprep.subr.bf16.mxu1 %v2793_v23  ;;  %v1082_v23 = vrot.slane %v3005_v28, 4 }
 0x25a   :  { %2398 = vmatmul.mubr.msk.f32.gmra.mrb[16].mxu1 %vm864_vm10, %v3012_v37  ;;  %v1083_v10 = vsel %vm132_vm1, %v1080_v7, %v1082_v23  ;;  %v1085_v12 = vsel %vm132_vm1, %v1082_v23, %v1084_v57 }
 0x25b   :  { %2400 = vmatprep.mubr.msk.f32.mxu1 %vm2795_vm9, %v2791_v0  ;;  %2612 = vmatpush3.bf16.msk.msra.mxu1 %vm2981_vm8, %v2610_v6 }
 0x25c   :  { %2454 = vmatprep.subr.bf16.mxu1 %v2791_v0 }
 0x25e   :  { %2401 = vmatmul.mubr.msk.f32.gmra.mrb[18].mxu1 %vm864_vm10, %v3019_v43 }
 0x25f   :  { %2419 = vmatprep.mubr.msk.f32.mxu1 %vm2795_vm9, %v2791_v0 }
 0x262   :  { %2420 = vmatmul.mubr.msk.f32.vlgmr.msra.gmra.mrb[20].mxu1 %vm864_vm10, %v1081_v9 }
 0x263   :  { %2422 = vmatprep.mubr.msk.f32.mxu1 %vm2795_vm9, %v2791_v0  ;;  %2455 = vmatpush3.bf16.msra.mxu1 %v2685_v16 }
 0x264   :  { %2456 = vmatprep.subr.bf16.mxu1 %v2791_v0 }
 0x266   :  { %2423 = vmatmul.mubr.msk.f32.gmra.mrb[22].mxu1 %vm864_vm10, %v1083_v10 }
 0x267   :  { %2425 = vmatprep.mubr.msk.f32.mxu1 %vm2795_vm9, %v2791_v0 }
 0x26a   :  { %2426 = vmatmul.mubr.msk.f32.gmra.mrb[24].mxu1 %vm864_vm10, %v1085_v12 }
 0x26b   :  { %2428 = vmatprep.mubr.msk.f32.mxu1 %vm2795_vm9, %v2791_v0 }
 0x26e   :  { %2429 = vmatmul.mubr.msk.f32.gmra.mrb[26].mxu1 %vm864_vm10, %v1087_v14 }
 0x26f   :  { %2431 = vmatprep.mubr.msk.f32.mxu1 %vm2795_vm9, %v2791_v0 }
 0x272   :  { %2432 = vmatmul.mubr.msk.f32.gmra.mrb[28].mxu1 %vm864_vm10, %v1089_v15 }
 0x273   :  { %2460 = vmatprep.mubr.msk.bf16.mxu1 %vm2795_vm9, %v2791_v0 }
 0x30d   :  { %v944_v17 = vpop.f32.mrb[0].mxu1 }
 0x30e   :  { %v2359_v18 = vpop.f32.mrb[1].mxu1 }
 0x30f   :  { %v2686_v18 = vld [vmem:[#allocation6 + $0x20] sm:$0xff]  }
 0x310   :  { %2437 = vmatpush3.bf16.msra.mxu0 %v2686_v18  ;;  %2457 = vmatpush3.bf16.msra.mxu1 %v2686_v18  ;;  %v2706_v18 = vld [vmem:[#allocation6 + $0xc8] sm:$0xff]  }
 0x311   :  { %v949_v19 = vpop.f32.mrb[2].mxu1  ;;  %2438 = vmatprep.subr.bf16.mxu0 %v2791_v0  ;;  %2458 = vmatprep.subr.bf16.mxu1 %v2791_v0 }
 0x312   :  { %v2362_v20 = vpop.f32.mrb[3].mxu1 }
 0x315   :  { %v954_v21 = vpop.f32.mrb[4].mxu1 }
 0x316   :  { %v2365_v22 = vpop.f32.mrb[5].mxu1 }
 0x319   :  { %v959_v24 = vpop.f32.mrb[6].mxu1 }
 0x31a   :  { %v2368_v25 = vpop.f32.mrb[7].mxu1 }
 0x31d   :  { %v964_v26 = vpop.f32.mrb[8].mxu1 }
 0x31e   :  { %v2371_v27 = vpop.f32.mrb[9].mxu1 }
 0x321   :  { %v1047_v28 = vpop.f32.mrb[10].mxu1 }
 0x322   :  { %v1048_v29 = vadd.f32 %v1047_v28, %v944_v17  ;;  %v2390_v30 = vpop.f32.mrb[11].mxu1 }
 0x325   :  { %v1052_v31 = vpop.f32.mrb[12].mxu1 }
 0x326   :  { %v1053_v32 = vadd.f32 %v1052_v31, %v949_v19  ;;  %v2393_v33 = vpop.f32.mrb[13].mxu1  ;;  %v2687_v19 = vld [vmem:[#allocation6 + $0x28] sm:$0xff]  }
 0x329   :  { %v1057_v34 = vpop.f32.mrb[14].mxu1 }
 0x32a   :  { %v1058_v35 = vadd.f32 %v1057_v34, %v954_v21  ;;  %v2396_v36 = vpop.f32.mrb[15].mxu1 }
 0x32d   :  { %v1062_v37 = vpop.f32.mrb[16].mxu1 }
 0x32e   :  { %v1063_v38 = vadd.f32 %v1062_v37, %v959_v24  ;;  %v2399_v39 = vpop.f32.mrb[17].mxu1  ;;  %v2797_v24 = vmov 65535  }
 0x32f   :  { %v1321_v25 = vsel %vm108_vm4, 4294967295, %v2797_v24 }
 0x330   :  { %v3105_v27 = vsel %vm1320_vm11, %v1321_v25, 0 }
 0x331   :  { %v1067_v40 = vpop.f32.mrb[18].mxu1  ;;  %v1324_v30 = vand.u32 %v2687_v19, %v3105_v27  ;;  %v2707_v19 = vld [vmem:[#allocation6 + $0xd0] sm:$0xff]  }
 0x332   :  { %v1068_v41 = vadd.f32 %v1067_v40, %v964_v26  ;;  %v2402_v42 = vpop.f32.mrb[19].mxu1 }
 0x333   :  { %2439 = vmatpush3.bf16.msra.mxu0 %v1324_v30  ;;  %2459 = vmatpush3.bf16.msra.mxu1 %v1324_v30 }
 0x334   :  { %2444 = vmatprep.subr.bf16.mxu0 %v2791_v0  ;;  %2464 = vmatprep.subr.bf16.mxu1 %v2791_v0 }
 0x335   :  { %v1169_v43 = vpop.f32.mrb[20].mxu1 }
 0x336   :  { %v1193_v45 = vadd.f32 %v1169_v43, %v1048_v29  ;;  %v2421_v46 = vpop.f32.mrb[21].mxu1 }
 0x337   :  { %v2688_v46 = vld [vmem:[#allocation6] sm:$0xff]  }
 0x338   :  { %v1205_v47 = vadd.f32 %v2086_v44, %v1193_v45 }
 0x339   :  { %v1174_v49 = vpop.f32.mrb[22].mxu1 }
 0x33a   :  { %v1210_v50 = vmax.f32 %v1205_v47, 0.0  ;;  %v1194_v51 = vadd.f32 %v1174_v49, %v1053_v32  ;;  %v2424_v52 = vpop.f32.mrb[23].mxu1 }
 0x33b   :  { %v2690_v52 = vld [vmem:[#allocation6 + $0x10] sm:$0xff]  }
 0x33c   :  { %v1219_v53 = vmul.f32 %v2087_v48, %v1210_v50  ;;  %v1206_v54 = vadd.f32 %v2086_v44, %v1194_v51  ;;  %v2689_v51 = vld [vmem:[#allocation6 + $0x8] sm:$0xff]  }
 0x33d   :  { %v1179_v56 = vpop.f32.mrb[24].mxu1 }
 0x33e   :  { %v1211_v58 = vmax.f32 %v1206_v54, 0.0  ;;  %v1195_v59 = vadd.f32 %v1179_v56, %v1058_v35  ;;  %v2427_v60 = vpop.f32.mrb[25].mxu1  ;;  %v1228_v61 = vadd.f32 %v2088_v55, %v1219_v53  ;;  %v1387_v56 = vand.u32 %v2690_v52, %v3105_v27  ;;  %v2122_v52 = vld [vmem:[#allocation3 + $0x143] ss:$0 sm:$0xff] }
 0x33f   :  { %v2692_v60 = vld [vmem:[#allocation6 + $0x48] sm:$0xff]  }
 0x340   :  { %v1220_v62 = vmul.f32 %v2087_v48, %v1211_v58  ;;  %v1207_v63 = vadd.f32 %v2086_v44, %v1195_v59  ;;  %v1238_v6 = vrot.slane %v1228_v61, 2  ;;  %v2691_v59 = vld [vmem:[#allocation6 + $0x40] sm:$0xff]  }
 0x341   :  { %v1184_v1 = vpop.f32.mrb[26].mxu1 }
 0x342   :  { %v1229_v2 = vadd.f32 %v2088_v55, %v1220_v62  ;;  %v1212_v3 = vmax.f32 %v1207_v63, 0.0  ;;  %v1196_v4 = vadd.f32 %v1184_v1, %v1063_v38  ;;  %v2430_v5 = vpop.f32.mrb[27].mxu1  ;;  %v2694_v1 = vld [vmem:[#allocation6 + $0x58] sm:$0xff]  }
 0x343   :  { %v2696_v5 = vld [vmem:[#allocation6 + $0x68] sm:$0xff]  }
 0x344   :  { %v1239_v7 = vrot.slane %v1229_v2, 2  ;;  %v1221_v8 = vmul.f32 %v2087_v48, %v1212_v3  ;;  %v1208_v23 = vadd.f32 %v2086_v44, %v1196_v4  ;;  %v2695_v4 = vld [vmem:[#allocation6 + $0x60] sm:$0xff]  }
 0x345   :  { %v1189_v9 = vpop.f32.mrb[28].mxu1 }
 0x346   :  { %v1230_v57 = vadd.f32 %v2088_v55, %v1221_v8  ;;  %v1213_v10 = vmax.f32 %v1208_v23, 0.0  ;;  %v1197_v11 = vadd.f32 %v1189_v9, %v1068_v41  ;;  %v2433_v12 = vpop.f32.mrb[29].mxu1  ;;  %v1240_v13 = vsel %vm344_vm5, %v1238_v6, %v1239_v7  ;;  %v2697_v23 = vld [vmem:[#allocation6 + $0x80] sm:$0xff]  }
 0x347   :  { %v1252_v14 = vmax.f32 %v1228_v61, %v1240_v13  ;;  %v2693_v61 = vld [vmem:[#allocation6 + $0x50] sm:$0xff]   ;;  %v2700_v12 = vld [vmem:[#allocation6 + $0x98] sm:$0xff]   ;;  %v2701_v13 = vld [vmem:[#allocation6 + $0xa0] sm:$0xff]  }
 0x348   :  { %v1241_v15 = vrot.slane %v1230_v57, 2  ;;  %v1222_v16 = vmul.f32 %v2087_v48, %v1213_v10  ;;  %v1209_v17 = vadd.f32 %v2086_v44, %v1197_v11  ;;  %v1547_v62 = vand.u32 %v2693_v61, %v3105_v27  ;;  %v2699_v10 = vld [vmem:[#allocation6 + $0x90] sm:$0xff]  }
 0x34a   :  { %v1231_v20 = vadd.f32 %v2088_v55, %v1222_v16  ;;  %v1214_v21 = vmax.f32 %v1209_v17, 0.0  ;;  %v1242_v22 = vsel %vm344_vm5, %v1239_v7, %v1241_v15  ;;  %v1662_v7 = vand.u32 %v2696_v5, %v3105_v27  ;;  %v2704_v16 = vld [vmem:[#allocation6 + $0xb8] sm:$0xff]   ;;  %v2705_v17 = vld [vmem:[#allocation6 + $0xc0] sm:$0xff]  }
 0x34b   :  { %v1253_v26 = vmax.f32 %v1229_v2, %v1242_v22 }
 0x34c   :  { %v1243_v28 = vrot.slane %v1231_v20, 2  ;;  %v1223_v29 = vmul.f32 %v2087_v48, %v1214_v21  ;;  %v2709_v21 = vld [vmem:[#allocation6 + $0xe0] sm:$0xff]  }
 0x34d   :  { %v2680_v31 = vpack.i.bf16 %v1253_v26, %v1252_v14 }
 0x34e   :  { %v1232_v32 = vadd.f32 %v2088_v55, %v1223_v29  ;;  %v1244_v33 = vsel %vm344_vm5, %v1241_v15, %v1243_v28  ;;  %v2703_v15 = vld [vmem:[#allocation6 + $0xb0] sm:$0xff]  }
 0x34f   :  { %2681 = vrot.lane.b32.xlu1 %v2680_v31, %s2796_s0  ;;  %v1254_v34 = vmax.f32 %v1230_v57, %v1244_v33  ;;  %v2698_v57 = vld [vmem:[#allocation6 + $0x88] sm:$0xff]   ;;  %v2109_v29 = vld [vmem:[#allocation3 + $0x13e] ss:$0 sm:$0xff] }
 0x350   :  { %v1245_v35 = vrot.slane %v1232_v32, 2 }
 0x352   :  { %v1246_v36 = vsel %vm344_vm5, %v1243_v28, %v1245_v35  ;;  %v1256_v39 = vmax.f32 %v1232_v32, %v1245_v35  ;;  %v2110_v35 = vld [vmem:[#allocation3 + $0x13f] ss:$0 sm:$0xff] }
 0x353   :  { %v1255_v37 = vmax.f32 %v1231_v20, %v1246_v36  ;;  %v2708_v20 = vld [vmem:[#allocation6 + $0xd8] sm:$0xff]  }
 0x355   :  { %v2675_v38 = vpack.i.bf16 %v1255_v37, %v1254_v34 }
 0x357   :  { %2676 = vrot.lane.b32.xlu0 %v2675_v38, %s2796_s0 }
 0x35b   :  { %1270 = vrot.lane.b32.xlu0 %v1256_v39, %s2796_s0 }
 0x3c1   :  { %v2682_v40 = vpop.permute.xlu1 %2681 }
 0x3c2   :  { %v2684_v41 = vunpack.i.h.bf16 %v2682_v40  ;;  %v2683_v42 = vunpack.i.l.bf16 %v2682_v40 }
 0x3c4   :  { %v1278_v43 = vmax.f32 %v1253_v26, %v2684_v41  ;;  %v1277_v44 = vmax.f32 %v1252_v14, %v2683_v42  ;;  %v2702_v14 = vld [vmem:[#allocation6 + $0xa8] sm:$0xff]   ;;  %v2711_v42 = vld [vmem:[#allocation6 + $0xf0] sm:$0xff]  }
 0x3c5   :  { %v2710_v41 = vld [vmem:[#allocation6 + $0xe8] sm:$0xff]  }
 0x3c6   :  { %v3116_v45 = vpack.c.bf16 %v1278_v43, %v1277_v44  ;;  %v2712_v43 = vld [vmem:[#allocation6 + $0xf8] sm:$0xff]  }
 0x3c7   :  { %v2112_v44 = vld [vmem:[#allocation3 + $0x141] ss:$0 sm:$0xff] }
 0x3c8   :  { %v1298_v47 = vrot.slane %v3116_v45, 2  ;;  %v1525_v2 = vrot.slane %v3116_v45, 4  ;;  %v1640_v9 = vrot.slane %v3116_v45, 6 }
 0x3c9   :  { %v2677_v48 = vpop.permute.xlu0 %2676 }
 0x3ca   :  { %v2679_v49 = vunpack.i.h.bf16 %v2677_v48  ;;  %v2678_v50 = vunpack.i.l.bf16 %v2677_v48  ;;  %2441 = vmatmul.mubr.msk.bf16.vlgmr.msra.gmra.mrb[8].mxu0 %vm1316_vm12, %v1298_v47  ;;  %v2121_v48 = vld [vmem:[#allocation3 + $0x142] ss:$0 sm:$0xff] }
 0x3cb   :  { %2445 = vmatpush3.bf16.msra.mxu0 %v2688_v46  ;;  %2450 = vmatprep.mubr.msk.bf16.mxu0 %vm2795_vm9, %v2791_v0 }
 0x3cc   :  { %v1280_v53 = vmax.f32 %v1255_v37, %v2679_v49  ;;  %v1279_v54 = vmax.f32 %v1254_v34, %v2678_v50  ;;  %2446 = vmatprep.subr.bf16.mxu0 %v2791_v0  ;;  %v2111_v37 = vld [vmem:[#allocation3 + $0x140] ss:$0 sm:$0xff] }
 0x3cd   :  { %v1271_v3 = vpop.permute.xlu0 %1270 }
 0x3ce   :  { %v1283_v55 = vpack.c.bf16 %v1280_v53, %v1279_v54  ;;  %v1281_v6 = vmax.f32 %v1256_v39, %v1271_v3 }
 0x3cf   :  { %2447 = vmatpush3.bf16.msra.mxu0 %v2689_v51 }
 0x3d0   :  { %v1430_v58 = vrot.slane %v1283_v55, 6  ;;  %2448 = vmatprep.subr.bf16.mxu0 %v2791_v0  ;;  %v1474_v63 = vrot.slane %v1283_v55, 4  ;;  %v1284_v8 = vpack.c.bf16 %v1281_v6, %v1281_v6 }
 0x3d2   :  { %2461 = vmatmul.mubr.msk.bf16.vlgmr.msra.gmra.mrb[32].mxu1 %vm1316_vm12, %v1430_v58  ;;  %v1706_v11 = vrot.slane %v1284_v8, 2 }
 0x3d3   :  { %2465 = vmatpush3.bf16.msra.mxu1 %v2688_v46  ;;  %2449 = vmatpush3.bf16.msra.mxu0 %v1387_v56 }
 0x3d4   :  { %2466 = vmatprep.subr.bf16.mxu1 %v2791_v0  ;;  %2474 = vmatprep.subr.bf16.mxu0 %v2791_v0 }
 0x3d5   :  { %2470 = vmatprep.mubr.msk.bf16.mxu1 %vm2795_vm9, %v2791_v0 }
 0x3d6   :  { %2451 = vmatmul.mubr.msk.bf16.vlgmr.msra.gmra.mrb[8].mxu0 %vm1316_vm12, %v3116_v45 }
 0x3d7   :  { %2467 = vmatpush3.bf16.msra.mxu1 %v2689_v51  ;;  %2475 = vmatpush3.bf16.msra.mxu0 %v2691_v59 }
 0x3d8   :  { %2468 = vmatprep.subr.bf16.mxu1 %v2791_v0  ;;  %2476 = vmatprep.subr.bf16.mxu0 %v2791_v0 }
 0x3d9   :  { %2480 = vmatprep.mubr.msk.bf16.mxu0 %vm2795_vm9, %v2791_v0 }
 0x3db   :  { %2469 = vmatpush3.bf16.msra.mxu1 %v1387_v56  ;;  %2477 = vmatpush3.bf16.msra.mxu0 %v2692_v60  ;;  %v2123_v56 = vld [vmem:[#allocation3 + $0x144] ss:$0 sm:$0xff] }
 0x3dc   :  { %2484 = vmatprep.subr.bf16.mxu1 %v2791_v0  ;;  %2478 = vmatprep.subr.bf16.mxu0 %v2791_v0 }
 0x3de   :  { %2471 = vmatmul.mubr.msk.bf16.vlgmr.msra.gmra.mrb[32].mxu1 %vm1316_vm12, %v1474_v63 }
 0x3df   :  { %2485 = vmatpush3.bf16.msra.mxu1 %v2691_v59  ;;  %2479 = vmatpush3.bf16.msra.mxu0 %v1547_v62 }
 0x3e0   :  { %2486 = vmatprep.subr.bf16.mxu1 %v2791_v0  ;;  %2494 = vmatprep.subr.bf16.mxu0 %v2791_v0 }
 0x3e1   :  { %2490 = vmatprep.mubr.msk.bf16.mxu1 %vm2795_vm9, %v2791_v0 }
 0x3e2   :  { %2481 = vmatmul.mubr.msk.bf16.vlgmr.msra.gmra.mrb[8].mxu0 %vm1316_vm12, %v1525_v2 }
 0x3e3   :  { %2487 = vmatpush3.bf16.msra.mxu1 %v2692_v60  ;;  %2495 = vmatpush3.bf16.msra.mxu0 %v2694_v1 }
 0x3e4   :  { %2488 = vmatprep.subr.bf16.mxu1 %v2791_v0  ;;  %2496 = vmatprep.subr.bf16.mxu0 %v2791_v0 }
 0x3e5   :  { %2500 = vmatprep.mubr.msk.bf16.mxu0 %vm2795_vm9, %v2791_v0 }
 0x3e7   :  { %2489 = vmatpush3.bf16.msra.mxu1 %v1547_v62  ;;  %2497 = vmatpush3.bf16.msra.mxu0 %v2695_v4 }
 0x3e8   :  { %2504 = vmatprep.subr.bf16.mxu1 %v2791_v0  ;;  %2498 = vmatprep.subr.bf16.mxu0 %v2791_v0 }
 0x3ea   :  { %2491 = vmatmul.mubr.msk.bf16.vlgmr.msra.gmra.mrb[32].mxu1 %vm1316_vm12, %v1284_v8 }
 0x3eb   :  { %2505 = vmatpush3.bf16.msra.mxu1 %v2694_v1  ;;  %2499 = vmatpush3.bf16.msra.mxu0 %v1662_v7 }
 0x3ec   :  { %2506 = vmatprep.subr.bf16.mxu1 %v2791_v0  ;;  %2510 = vmatprep.mubr.msk.bf16.mxu1 %vm2795_vm9, %v2791_v0 }
 0x3ed   :  { %2514 = vmatprep.subr.bf16.mxu0 %v2791_v0 }
 0x3ee   :  { %2501 = vmatmul.mubr.msk.bf16.vlgmr.msra.gmra.mrb[8].mxu0 %vm1316_vm12, %v1640_v9 }
 0x3ef   :  { %2507 = vmatpush3.bf16.msra.mxu1 %v2695_v4  ;;  %2515 = vmatpush3.bf16.msra.mxu0 %v2697_v23 }
 0x3f0   :  { %2508 = vmatprep.subr.bf16.mxu1 %v2791_v0  ;;  %2516 = vmatprep.subr.bf16.mxu0 %v2791_v0 }
 0x3f1   :  { %2530 = vmatprep.mubr.msk.bf16.mxu0 %vm2795_vm9, %v2791_v0 }
 0x3f3   :  { %2509 = vmatpush3.bf16.msra.mxu1 %v1662_v7  ;;  %2517 = vmatpush3.bf16.msra.mxu0 %v2698_v57 }
 0x3f4   :  { %2518 = vmatprep.subr.bf16.mxu0 %v2791_v0  ;;  %2534 = vmatprep.subr.bf16.mxu1 %v2791_v0 }
 0x3f6   :  { %2511 = vmatmul.mubr.msk.bf16.vlgmr.msra.gmra.mrb[32].mxu1 %vm1316_vm12, %v1706_v11 }
 0x3f7   :  { %2519 = vmatpush3.bf16.msra.mxu0 %v2699_v10  ;;  %2550 = vmatprep.mubr.msk.bf16.mxu1 %vm2795_vm9, %v2791_v0 }
 0x3f8   :  { %2520 = vmatprep.subr.bf16.mxu0 %v2791_v0  ;;  %2535 = vmatpush3.bf16.msra.mxu1 %v2705_v17 }
 0x3f9   :  { %2536 = vmatprep.subr.bf16.mxu1 %v2791_v0 }
 0x3fb   :  { %2521 = vmatpush3.bf16.msra.mxu0 %v2700_v12 }
 0x3fc   :  { %2522 = vmatprep.subr.bf16.mxu0 %v2791_v0  ;;  %2537 = vmatpush3.bf16.msra.mxu1 %v2706_v18 }
 0x3fd   :  { %2538 = vmatprep.subr.bf16.mxu1 %v2791_v0 }
 0x3ff   :  { %2523 = vmatpush3.bf16.msra.mxu0 %v2701_v13 }
 0x400   :  { %2524 = vmatprep.subr.bf16.mxu0 %v2791_v0  ;;  %2539 = vmatpush3.bf16.msra.mxu1 %v2707_v19 }
 0x401   :  { %2540 = vmatprep.subr.bf16.mxu1 %v2791_v0 }
 0x403   :  { %2525 = vmatpush3.bf16.msra.mxu0 %v2702_v14 }
 0x404   :  { %2526 = vmatprep.subr.bf16.mxu0 %v2791_v0  ;;  %2541 = vmatpush3.bf16.msra.mxu1 %v2708_v20 }
 0x405   :  { %2542 = vmatprep.subr.bf16.mxu1 %v2791_v0 }
 0x407   :  { %2527 = vmatpush3.bf16.msra.mxu0 %v2703_v15 }
 0x408   :  { %2528 = vmatprep.subr.bf16.mxu0 %v2791_v0  ;;  %2543 = vmatpush3.bf16.msra.mxu1 %v2709_v21 }
 0x409   :  { %2544 = vmatprep.subr.bf16.mxu1 %v2791_v0 }
 0x40b   :  { %2529 = vmatpush3.bf16.msra.mxu0 %v2704_v16 }
 0x40c   :  { %2545 = vmatpush3.bf16.msra.mxu1 %v2710_v41 }
 0x40d   :  { %2546 = vmatprep.subr.bf16.mxu1 %v2791_v0 }
 0x410   :  { %2547 = vmatpush3.bf16.msra.mxu1 %v2711_v42 }
 0x411   :  { %2548 = vmatprep.subr.bf16.mxu1 %v2791_v0 }
 0x414   :  { %2549 = vmatpush3.bf16.msra.mxu1 %v2712_v43 }
 0x4c1   :  { %v1698_v22 = vpop.f32.mrb[8].mxu0 }
 0x4c2   :  { %v2502_v24 = vpop.f32.mrb[9].mxu0 }
 0x4c3   :  { %v1701_v25 = vpop.f32.mrb[10].mxu0 }
 0x4c4   :  { %v2503_v26 = vpop.f32.mrb[11].mxu0 }
 0x4c9   :  { %v1744_v27 = vpop.f32.mrb[32].mxu1 }
 0x4ca   :  { %v1752_v28 = vrot.slane %v1744_v27, 7  ;;  %v2512_v30 = vpop.f32.mrb[33].mxu1 }
 0x4cb   :  { %v1747_v31 = vpop.f32.mrb[34].mxu1 }
 0x4cc   :  { %v1755_v32 = vsel %vm1754_vm13, %v1698_v22, %v1752_v28  ;;  %v2513_v33 = vpop.f32.mrb[35].mxu1 }
 0x4cd   :  { %v1761_v34 = vadd.f32 %v2109_v29, %v1755_v32 }
 0x4cf   :  { %v1762_v36 = vmax.f32 %v1761_v34, 0.0 }
 0x4d1   :  { %v1768_v38 = vmul.f32 %v2110_v35, %v1762_v36 }
 0x4d3   :  { %v1774_v39 = vadd.f32 %v2111_v37, %v1768_v38 }
 0x4d5   :  { %v1775_v40 = vpack.c.bf16 %v1774_v39, %v1774_v39 }
 0x4d7   :  { %2531 = vmatmul.mubr.bf16.vlgmr.msra.gmra.mrb[12].mxu0 %v1775_v40 }
 0x5aa   :  { %v1880_v45 = vpop.f32.mrb[12].mxu0 }
 0x5ab   :  { %v1881_v46 = vadd.f32 %v2112_v44, %v1880_v45  ;;  %v2532_v47 = vpop.f32.mrb[13].mxu0 }
 0x5ac   :  { %v1883_v49 = vpop.f32.mrb[14].mxu0 }
 0x5ad   :  { %v1886_v50 = vmax.f32 %v1881_v46, 0.0  ;;  %v2533_v51 = vpop.f32.mrb[15].mxu0 }
 0x5af   :  { %v1892_v53 = vmul.f32 %v2121_v48, %v1886_v50 }
 0x5b1   :  { %v1898_v54 = vadd.f32 %v2122_v52, %v1892_v53 }
 0x5b3   :  { %v1899_v55 = vpack.c.bf16 %v1898_v54, %v1898_v54 }
 0x5b5   :  { %2551 = vmatmul.mubr.bf16.vlgmr.msra.gmra.mrb[36].mxu1 %v1899_v55 }
 0x688   :  { %v2004_v58 = vpop.f32.mrb[36].mxu1 }
 0x689   :  { %v2005_v59 = vadd.f32 %v2123_v56, %v2004_v58  ;;  %v2552_v0 = vpop.f32.mrb[37].mxu1 }
 0x68a   :  { %v2007_v60 = vpop.f32.mrb[38].mxu1 }
 0x68b   :  { %2010 = vst [vmem:[#allocation8] sm:$0x3] %v2005_v59  ;;  %v2553_v61 = vpop.f32.mrb[39].mxu1 }
 0x68c   :  { %2768 = shalt.err (!%p2765_p6)
}
 0x68d   :  { %s2769_s29 = scalar_lea.hbm %s3196_s3, 32 }
 0x68e   :  { %p2770_p7 = scmp.ne.s32.totalorder %s3196_s3, %s2769_s29  ;;  %p2773_p8 = scmp.lt.u32.totalorder %s2769_s29, %s3196_s3 }
 0x690   :  { %p2775_p9 = pnand %p2773_p8, %p2770_p7 }
 0x692   :  { %2778 = shalt.err (!%p2775_p9)
}
 0x693   :  { %2020 = dma.vmem_to_hbm [thread:$0]  %s2018_s25, 32, %s3196_s3, [#allocation5]  }
 0x694   :  { %2783 = dma.done.wait [#allocation5], 32  }
 0x695   :  { %2784 = vsyncadd [#allocation5], 4294967264 }
 0x696   :  { %2024 = vsyncpa [#allocation4], 1 }
 0x697   :  { %2025 = vsyncpa [#allocation7], 1 }
 0x698   :  { %2026 = vsyncpa [#allocation5], 1 }

</bundles_post_ra>
